<compile_context>
chip_gen: v7x
topology: tpu7x:2x2x1
jax: 0.10.0
libtpu: 0.0.40
codegen_flags: <defaults>
</compile_context>

<pallas_src>
import functools
import math

import numpy as np
import jax
import jax.numpy as jnp
from jax import lax
from jax.experimental import pallas as pl
from jax.experimental.pallas import tpu as pltpu

CFG = dict(
    vocab_size=256,
    context_length=16,
    emb_dim=128,
    n_heads=4,
    n_layers=2,
    drop_rate=0.0,
    qkv_bias=False,
)

_EPS = 1e-5
_GELU_C = math.sqrt(2.0 / math.pi)


# ----------------------------- shared math
def _layernorm_ref(x, scale, shift):
    mean = jnp.mean(x, axis=-1, keepdims=True)
    var = jnp.mean((x - mean) ** 2, axis=-1, keepdims=True)  # unbiased=False
    return scale * ((x - mean) / jnp.sqrt(var + _EPS)) + shift


def _layernorm_kernel(x, scale, shift):
    # Single-pass stats + rsqrt (EUP) instead of divide.
    mean = jnp.mean(x, axis=-1, keepdims=True)
    var = jnp.mean(x * x, axis=-1, keepdims=True) - mean * mean
    return scale * ((x - mean) * lax.rsqrt(var + _EPS)) + shift


def _gelu(x):
    return 0.5 * x * (1.0 + jnp.tanh(_GELU_C * (x + 0.044715 * x * x * x)))


# ----------------------------- fused transformer-layer kernel
def gpt_layers_kernel(
    mask_ref, hmask_ref, x_ref,
    ln1s_ref, ln1b_ref, wqkv_ref, wo_ref, bo_ref,
    ln2s_ref, ln2b_ref, w1_ref, b1_ref, w2_ref, b2_ref,
    lnfs_ref, lnfb_ref,
    o_ref,
    xs_ref,
    *, n_heads,
):
    layer = pl.program_id(1)
    n_layers = pl.num_programs(1)

    # Layer 0: load this sequence's embeddings into the resident f32 scratch.
    @pl.when(layer == 0)
    def _():
        xs_ref[...] = x_ref[0].astype(jnp.float32)

    x = xs_ref[...]                                   # (T, D) f32
    T, D = x.shape

    # ---------------- attention sub-block (pre-norm) ----------------
    xn = _layernorm_kernel(x, ln1s_ref[0], ln1b_ref[0])
    qkv = jnp.dot(xn.astype(jnp.bfloat16), wqkv_ref[0],
                  preferred_element_type=jnp.float32)          # (T, 3D)
    # 128-aligned lane slices; 1/sqrt(hd) already folded into the Q weights.
    q = qkv[:, 0 * D:1 * D].astype(jnp.bfloat16)
    k = qkv[:, 1 * D:2 * D].astype(jnp.bfloat16)
    v = qkv[:, 2 * D:3 * D].astype(jnp.bfloat16)

    add_mask = mask_ref[...]                           # (T, T) additive mask

    # Heads via precomputed 0/1 lane masks: every matmul is full-128-lane
    # wide, no misaligned slices, ctx accumulated by summation (no concat).
    ctx = jnp.zeros((T, D), jnp.float32)
    for h in range(n_heads):                           # static unroll
        mh = hmask_ref[h:h + 1, :].astype(jnp.bfloat16)          # (1, D)
        s = lax.dot_general(q * mh, k, (((1,), (1,)), ((), ())),
                            preferred_element_type=jnp.float32)  # (T, T)
        s = s + add_mask
        m = jnp.max(s, axis=-1, keepdims=True)
        e = jnp.exp(s - m)
        p = e * pl.reciprocal(jnp.sum(e, axis=-1, keepdims=True), approx=True)
        ctx = ctx + jnp.dot(p.astype(jnp.bfloat16), v * mh,
                            preferred_element_type=jnp.float32)  # (T, D)

    att = jnp.dot(ctx.astype(jnp.bfloat16), wo_ref[0],
                  preferred_element_type=jnp.float32) + bo_ref[0]
    x = x + att                      # residual (dropout = identity, p = 0.0)

    # ---------------- feed-forward sub-block (pre-norm) ----------------
    xn2 = _layernorm_kernel(x, ln2s_ref[0], ln2b_ref[0])
    h1 = jnp.dot(xn2.astype(jnp.bfloat16), w1_ref[0],
                 preferred_element_type=jnp.float32) + b1_ref[0]
    h1 = _gelu(h1)                                    # f32 VPU/EUP math
    h2 = jnp.dot(h1.astype(jnp.bfloat16), w2_ref[0],
                 preferred_element_type=jnp.float32) + b2_ref[0]
    x = x + h2
    xs_ref[...] = x                                   # stays resident in VMEM

    # ---------------- final norm (last layer only) ----------------
    @pl.when(layer == n_layers - 1)
    def _():
        o_ref[0] = _layernorm_kernel(x, lnfs_ref[...], lnfb_ref[...]
                                     ).astype(o_ref.dtype)


# ----------------------------- V-tiled LM-head kernel
def lm_head_kernel(x_ref, w_ref, o_ref):
    o_ref[...] = jnp.dot(x_ref[...].astype(jnp.bfloat16), w_ref[...],
                         preferred_element_type=jnp.float32
                         ).astype(o_ref.dtype)


# ----------------------------- wrapper
def gpt_forward_pallas(in_idx, kp, cfg):
    B, T = in_idx.shape
    D, V, L, nh = cfg["emb_dim"], cfg["vocab_size"], cfg["n_layers"], cfg["n_heads"]
    Hff = 4 * D
    N = B * T
    hd = D // nh

    # token + positional embedding (gather is plain-JAX glue)
    x = (kp["tok_emb"][in_idx] + kp["pos_emb"][:T]).astype(jnp.float32)  # (B,T,D)

    # Layer-invariant constants, fetched once and resident across the grid.
    causal = jnp.tril(jnp.ones((T, T), dtype=bool))
    add_mask = jnp.where(causal, 0.0, -1e30).astype(jnp.float32)          # (T, T)
    head_ids = lax.broadcasted_iota(jnp.int32, (nh, D), 1) // hd
    hmask = (head_ids == jnp.arange(nh)[:, None]).astype(jnp.float32)    # (nh, D)

    kernel = functools.partial(gpt_layers_kernel, n_heads=nh)

    def _lw(shape):     # per-layer stacked operand, selected by the layer axis
        return pl.BlockSpec((1,) + shape, lambda b, l: (l,) + (0,) * len(shape))

    def _const(shape):  # layer/batch-invariant operand, resident across grid
        return pl.BlockSpec(shape, lambda b, l: (0,) * len(shape))

    in_specs = [
        _const((T, T)),                               # additive causal mask
        _const((nh, D)),                              # head lane masks
        pl.BlockSpec((1, T, D), lambda b, l: (b, 0, 0)),  # embeddings (per batch)
        _lw((1, D)), _lw((1, D)),                     # ln1 scale / shift
        _lw((D, 3 * D)),                              # fused Wqkv (bf16, Q prescaled)
        _lw((D, D)), _lw((1, D)),                     # Wo (bf16), bo
        _lw((1, D)), _lw((1, D)),                     # ln2 scale / shift
        _lw((D, Hff)), _lw((1, Hff)),                 # W1 (bf16), b1
        _lw((Hff, D)), _lw((1, D)),                   # W2 (bf16), b2
        _const((1, D)), _const((1, D)),               # final-norm scale / shift
    ]

    args = (add_mask, hmask, x,
            kp["ln1_s"], kp["ln1_b"], kp["wqkv"], kp["wo"], kp["bo"],
            kp["ln2_s"], kp["ln2_b"], kp["w1"], kp["b1"], kp["w2"], kp["b2"],
            kp["lnf_s"], kp["lnf_b"])

    flops_layer = (2 * T * D * 3 * D          # fused QKV
                   + 4 * nh * T * T * D       # masked-head scores + PV
                   + 2 * T * D * D            # out projection
                   + 4 * T * D * Hff)         # MLP
    cost1 = pl.CostEstimate(
        flops=int(B * L * flops_layer),
        transcendentals=int(B * L * (nh * T * T + T * Hff + 3 * T)),
        bytes_accessed=int(sum(int(a.size) * a.dtype.itemsize for a in args)
                           + B * T * D * 4),
    )

    xf = pl.pallas_call(
        kernel,
        grid=(B, L),
        in_specs=in_specs,
        out_specs=pl.BlockSpec((1, T, D), lambda b, l: (b, 0, 0)),
        out_shape=jax.ShapeDtypeStruct((B, T, D), jnp.float32),
        scratch_shapes=[pltpu.VMEM((T, D), jnp.float32)],   # resident activations
        compiler_params=pltpu.CompilerParams(
            dimension_semantics=("parallel", "arbitrary")),  # batch || , layers serial
        cost_estimate=cost1,
    )(*args)

    # ---------------- LM head: V-tiled, lane-dense output blocks ----------------
    tv = min(128, V)
    xf2d = xf.reshape(N, D)
    cost2 = pl.CostEstimate(
        flops=2 * N * D * V, transcendentals=0,
        bytes_accessed=N * D * 4 + D * V * 2 + N * V * 4)
    logits2d = pl.pallas_call(
        lm_head_kernel,
        grid=(V // tv,),
        in_specs=[pl.BlockSpec((N, D), lambda v: (0, 0)),
                  pl.BlockSpec((D, tv), lambda v: (0, v))],
        out_specs=pl.BlockSpec((N, tv), lambda v: (0, v)),
        out_shape=jax.ShapeDtypeStruct((N, V), jnp.float32),
        compiler_params=pltpu.CompilerParams(dimension_semantics=("parallel",)),
        cost_estimate=cost2,
    )(xf2d, kp["out_w"])
    return logits2d.reshape(B, T, V)


# ----------------------------- pack f32 params for the kernels
def pack_params(params, cfg):
    """Stack per-layer weights along a leading L axis; bf16 for MXU operands.
    Folds 1/sqrt(head_dim) into the Q columns of the fused QKV weight."""
    blocks = params["blocks"]
    hd = cfg["emb_dim"] // cfg["n_heads"]
    inv_sqrt_hd = 1.0 / math.sqrt(hd)
    st = lambda name: jnp.stack([b[name] for b in blocks])
    return dict(
        tok_emb=params["tok_emb"], pos_emb=params["pos_emb"],
        ln1_s=st("ln1_s"), ln1_b=st("ln1_b"),
        wqkv=jnp.stack([jnp.concatenate(
            [b["wq"] * inv_sqrt_hd, b["wk"], b["wv"]], axis=1)
            for b in blocks]).astype(jnp.bfloat16),
        wo=st("wo").astype(jnp.bfloat16), bo=st("bo"),
        ln2_s=st("ln2_s"), ln2_b=st("ln2_b"),
        w1=st("w1").astype(jnp.bfloat16), b1=st("b1"),
        w2=st("w2").astype(jnp.bfloat16), b2=st("b2"),
        lnf_s=params["lnf_s"], lnf_b=params["lnf_b"],
        out_w=params["out_w"].astype(jnp.bfloat16),
    )


# ----------------------------- pure-JAX f32 reference (correctness check)
def gpt_reference(in_idx, params, cfg):
    T = in_idx.shape[1]
    x = params["tok_emb"][in_idx] + params["pos_emb"][:T]
    Hn = cfg["n_heads"]
    for bp in params["blocks"]:
        B, _, D = x.shape
        hd = D // Hn
        shortcut = x
        xn = _layernorm_ref(x, bp["ln1_s"], bp["ln1_b"])
        q = (xn @ bp["wq"]).reshape(B, T, Hn, hd).transpose(0, 2, 1, 3)
        k = (xn @ bp["wk"]).reshape(B, T, Hn, hd).transpose(0, 2, 1, 3)
        v = (xn @ bp["wv"]).reshape(B, T, Hn, hd).transpose(0, 2, 1, 3)
        s = jnp.einsum("bhqd,bhkd->bhqk", q, k)
        mask = jnp.tril(jnp.ones((T, T), bool))
        s = jnp.where(mask, s, -jnp.inf) / jnp.sqrt(jnp.float32(hd))
        p = jax.nn.softmax(s, axis=-1)
        ctx = jnp.einsum("bhqk,bhkd->bhqd", p, v).transpose(0, 2, 1, 3).reshape(B, T, D)
        x = shortcut + (ctx @ bp["wo"] + bp["bo"])
        shortcut = x
        xn = _layernorm_ref(x, bp["ln2_s"], bp["ln2_b"])
        h1 = _gelu(xn @ bp["w1"] + bp["b1"])
        x = shortcut + (h1 @ bp["w2"] + bp["b2"])
    xn = _layernorm_ref(x, params["lnf_s"], params["lnf_b"])
    return xn @ params["out_w"]


# ----------------------------- deterministic parameter init (f32)
def init_params(key, cfg):
    D, V = cfg["emb_dim"], cfg["vocab_size"]
    C, L, H = cfg["context_length"], cfg["n_layers"], 4 * cfg["emb_dim"]
    keys = jax.random.split(key, 3 + L)

    def nrm(k, shape, s=0.02):
        return (s * jax.random.normal(k, shape)).astype(jnp.float32)

    params = dict(
        tok_emb=nrm(keys[0], (V, D)),
        pos_emb=nrm(keys[1], (C, D)),
        out_w=nrm(keys[2], (D, V)),
        lnf_s=jnp.ones((1, D), jnp.float32),
        lnf_b=jnp.zeros((1, D), jnp.float32),
        blocks=[],
    )
    for l in range(L):
        ks = jax.random.split(keys[3 + l], 8)
        params["blocks"].append(dict(
            ln1_s=jnp.ones((1, D), jnp.float32), ln1_b=jnp.zeros((1, D), jnp.float32),
            wq=nrm(ks[0], (D, D)), wk=nrm(ks[1], (D, D)), wv=nrm(ks[2], (D, D)),
            wo=nrm(ks[3], (D, D)), bo=nrm(ks[4], (1, D), 0.01),
            ln2_s=jnp.ones((1, D), jnp.float32), ln2_b=jnp.zeros((1, D), jnp.float32),
            w1=nrm(ks[5], (D, H)), b1=nrm(ks[6], (1, H), 0.01),
            w2=nrm(ks[7], (H, D)), b2=jnp.zeros((1, D), jnp.float32),
        ))
    return params


if __name__ == "__main__":
    cfg = CFG
    key = jax.random.PRNGKey(0)
    pkey, ikey = jax.random.split(key)
    params = init_params(pkey, cfg)
    kparams = pack_params(params, cfg)

    B, T = 2, 8  # T <= context_length
    in_idx = jax.random.randint(ikey, (B, T), 0, cfg["vocab_size"], dtype=jnp.int32)

    fwd = jax.jit(lambda idx, p: gpt_forward_pallas(idx, p, cfg))
    logits = jax.block_until_ready(fwd(in_idx, kparams))
    assert logits.shape == (B, T, cfg["vocab_size"])

    # Kernel uses bf16 MXU operands (f32 accumulation) + approx-reciprocal
    # softmax; compare against the all-f32 reference with a matching tolerance.
    ref = gpt_reference(in_idx, params, cfg)
    np.testing.assert_allclose(np.asarray(logits), np.asarray(ref),
                               rtol=2e-2, atol=2e-2)
    print("KERNEL_OK")
</pallas_src>

<mosaic_0001>
module attributes {stable_mosaic.version = 11 : i64} {
  func.func @gpt_layers_kernel(%arg0: i32, %arg1: i32, %arg2: memref<8x8xf32, #tpu.memory_space<vmem>>, %arg3: memref<4x128xf32, #tpu.memory_space<vmem>>, %arg4: memref<1x8x128xf32, #tpu.memory_space<vmem>>, %arg5: memref<1x1x128xf32, #tpu.memory_space<vmem>>, %arg6: memref<1x1x128xf32, #tpu.memory_space<vmem>>, %arg7: memref<1x128x384xbf16, #tpu.memory_space<vmem>>, %arg8: memref<1x128x128xbf16, #tpu.memory_space<vmem>>, %arg9: memref<1x1x128xf32, #tpu.memory_space<vmem>>, %arg10: memref<1x1x128xf32, #tpu.memory_space<vmem>>, %arg11: memref<1x1x128xf32, #tpu.memory_space<vmem>>, %arg12: memref<1x128x512xbf16, #tpu.memory_space<vmem>>, %arg13: memref<1x1x512xf32, #tpu.memory_space<vmem>>, %arg14: memref<1x512x128xbf16, #tpu.memory_space<vmem>>, %arg15: memref<1x1x128xf32, #tpu.memory_space<vmem>>, %arg16: memref<1x128xf32, #tpu.memory_space<vmem>>, %arg17: memref<1x128xf32, #tpu.memory_space<vmem>>, %arg18: memref<1x8x128xf32, #tpu.memory_space<vmem>>, %arg19: memref<8x128xf32, #tpu.memory_space<vmem>>) attributes {dimension_semantics = [#tpu.dimension_semantics<parallel>, #tpu.dimension_semantics<arbitrary>], iteration_bounds = array<i64: 2, 2>, scalar_prefetch = 0 : i64, scratch_operands = 1 : i64, tpu.core_type = #tpu.core_type<tc>, window_params = [{pipeline_mode = #tpu.pipeline_mode<synchronous>, transform_indices = @transform_0, window_bounds = array<i64: 8, 8>}, {pipeline_mode = #tpu.pipeline_mode<synchronous>, transform_indices = @transform_1, window_bounds = array<i64: 4, 128>}, {transform_indices = @transform_2, window_bounds = array<i64: 1, 8, 128>}, {transform_indices = @transform_3, window_bounds = array<i64: 1, 1, 128>}, {transform_indices = @transform_4, window_bounds = array<i64: 1, 1, 128>}, {transform_indices = @transform_5, window_bounds = array<i64: 1, 128, 384>}, {transform_indices = @transform_6, window_bounds = array<i64: 1, 128, 128>}, {transform_indices = @transform_7, window_bounds = array<i64: 1, 1, 128>}, {transform_indices = @transform_8, window_bounds = array<i64: 1, 1, 128>}, {transform_indices = @transform_9, window_bounds = array<i64: 1, 1, 128>}, {transform_indices = @transform_10, window_bounds = array<i64: 1, 128, 512>}, {transform_indices = @transform_11, window_bounds = array<i64: 1, 1, 512>}, {transform_indices = @transform_12, window_bounds = array<i64: 1, 512, 128>}, {transform_indices = @transform_13, window_bounds = array<i64: 1, 1, 128>}, {pipeline_mode = #tpu.pipeline_mode<synchronous>, transform_indices = @transform_14, window_bounds = array<i64: 1, 128>}, {pipeline_mode = #tpu.pipeline_mode<synchronous>, transform_indices = @transform_15, window_bounds = array<i64: 1, 128>}, {transform_indices = @transform_16, window_bounds = array<i64: 1, 8, 128>}]} {
    %c0_i32 = arith.constant 0 : i32
    %0 = arith.cmpi eq, %arg1, %c0_i32 : i32
    %1 = arith.extui %0 : i1 to i32
    %c0_i32_0 = arith.constant 0 : i32
    %2 = arith.cmpi ne, %1, %c0_i32_0 : i32
    scf.if %2 {
      %c0_79 = arith.constant 0 : index
      %c0_80 = arith.constant 0 : index
      %c0_81 = arith.constant 0 : index
      %195 = vector.load %arg4[%c0_79, %c0_80, %c0_81] : memref<1x8x128xf32, #tpu.memory_space<vmem>>, vector<1x8x128xf32>
      %196 = vector.shape_cast %195 : vector<1x8x128xf32> to vector<8x128xf32>
      %c0_82 = arith.constant 0 : index
      %c0_83 = arith.constant 0 : index
      %197 = vector.load %arg19[%c0_82, %c0_83] : memref<8x128xf32, #tpu.memory_space<vmem>>, vector<8x128xf32>
      tpu.vector_store %arg19[%c0_82, %c0_83], %196 {strides = array<i32>} : memref<8x128xf32, #tpu.memory_space<vmem>>, vector<8x128xf32>,
    } else {
    }
    %c0 = arith.constant 0 : index
    %c0_1 = arith.constant 0 : index
    %3 = vector.load %arg19[%c0, %c0_1] : memref<8x128xf32, #tpu.memory_space<vmem>>, vector<8x128xf32>
    %c0_2 = arith.constant 0 : index
    %c0_3 = arith.constant 0 : index
    %c0_4 = arith.constant 0 : index
    %4 = vector.load %arg5[%c0_2, %c0_3, %c0_4] : memref<1x1x128xf32, #tpu.memory_space<vmem>>, vector<1x1x128xf32>
    %5 = vector.shape_cast %4 : vector<1x1x128xf32> to vector<1x128xf32>
    %c0_5 = arith.constant 0 : index
    %c0_6 = arith.constant 0 : index
    %c0_7 = arith.constant 0 : index
    %6 = vector.load %arg6[%c0_5, %c0_6, %c0_7] : memref<1x1x128xf32, #tpu.memory_space<vmem>>, vector<1x1x128xf32>
    %7 = vector.shape_cast %6 : vector<1x1x128xf32> to vector<1x128xf32>
    %cst = arith.constant dense<0.000000e+00> : vector<8xf32>
    %8 = vector.multi_reduction <add>, %3, %cst [1] : vector<8x128xf32> to vector<8xf32>
    %9 = vector.shape_cast %8 : vector<8xf32> to vector<8x1xf32>
    %cst_8 = arith.constant 1.280000e+02 : f32
    %10 = vector.broadcast %cst_8 : f32 to vector<8x1xf32>
    %11 = arith.divf %9, %10 : vector<8x1xf32>
    %12 = arith.mulf %3, %3 : vector<8x128xf32>
    %cst_9 = arith.constant dense<0.000000e+00> : vector<8xf32>
    %13 = vector.multi_reduction <add>, %12, %cst_9 [1] : vector<8x128xf32> to vector<8xf32>
    %14 = vector.shape_cast %13 : vector<8xf32> to vector<8x1xf32>
    %cst_10 = arith.constant 1.280000e+02 : f32
    %15 = vector.broadcast %cst_10 : f32 to vector<8x1xf32>
    %16 = arith.divf %14, %15 : vector<8x1xf32>
    %17 = arith.mulf %11, %11 : vector<8x1xf32>
    %18 = arith.subf %16, %17 : vector<8x1xf32>
    %19 = vector.broadcast %11 : vector<8x1xf32> to vector<8x128xf32>
    %20 = arith.subf %3, %19 : vector<8x128xf32>
    %cst_11 = arith.constant 9.99999974E-6 : f32
    %21 = vector.broadcast %cst_11 : f32 to vector<8x1xf32>
    %22 = arith.addf %18, %21 : vector<8x1xf32>
    %23 = math.rsqrt %22 : vector<8x1xf32>
    %24 = vector.broadcast %23 : vector<8x1xf32> to vector<8x128xf32>
    %25 = arith.mulf %20, %24 : vector<8x128xf32>
    %26 = vector.broadcast %5 : vector<1x128xf32> to vector<8x128xf32>
    %27 = arith.mulf %26, %25 : vector<8x128xf32>
    %28 = vector.broadcast %7 : vector<1x128xf32> to vector<8x128xf32>
    %29 = arith.addf %27, %28 : vector<8x128xf32>
    %30 = arith.truncf %29 : vector<8x128xf32> to vector<8x128xbf16>
    %c0_12 = arith.constant 0 : index
    %c0_13 = arith.constant 0 : index
    %c0_14 = arith.constant 0 : index
    %31 = vector.load %arg7[%c0_12, %c0_13, %c0_14] : memref<1x128x384xbf16, #tpu.memory_space<vmem>>, vector<1x128x384xbf16>
    %32 = vector.shape_cast %31 : vector<1x128x384xbf16> to vector<128x384xbf16>
    %cst_15 = arith.constant dense<0.000000e+00> : vector<8x384xf32>
    %33 = tpu.matmul %30, %32, %cst_15 {dimension_numbers = #tpu.dot_dimension_numbers<[1], [0], [0], [1], [0, 0, 1, 1], [], []>} : vector<8x128xbf16>, vector<128x384xbf16>, vector<8x384xf32> -> vector<8x384xf32>
    %34 = vector.extract_strided_slice %33 {offsets = [0, 0], sizes = [8, 128], strides = [1, 1]} : vector<8x384xf32> to vector<8x128xf32>
    %35 = arith.truncf %34 : vector<8x128xf32> to vector<8x128xbf16>
    %36 = vector.extract_strided_slice %33 {offsets = [0, 128], sizes = [8, 128], strides = [1, 1]} : vector<8x384xf32> to vector<8x128xf32>
    %37 = arith.truncf %36 : vector<8x128xf32> to vector<8x128xbf16>
    %38 = vector.extract_strided_slice %33 {offsets = [0, 256], sizes = [8, 128], strides = [1, 1]} : vector<8x384xf32> to vector<8x128xf32>
    %39 = arith.truncf %38 : vector<8x128xf32> to vector<8x128xbf16>
    %c0_16 = arith.constant 0 : index
    %c0_17 = arith.constant 0 : index
    %40 = vector.load %arg2[%c0_16, %c0_17] : memref<8x8xf32, #tpu.memory_space<vmem>>, vector<8x8xf32>
    %cst_18 = arith.constant 0.000000e+00 : f32
    %41 = vector.broadcast %cst_18 : f32 to vector<8x128xf32>
    %c0_19 = arith.constant 0 : index
    %c0_20 = arith.constant 0 : index
    %42 = vector.load %arg3[%c0_19, %c0_20] : memref<4x128xf32, #tpu.memory_space<vmem>>, vector<1x128xf32>
    %43 = arith.truncf %42 : vector<1x128xf32> to vector<1x128xbf16>
    %44 = vector.broadcast %43 : vector<1x128xbf16> to vector<8x128xbf16>
    %45 = arith.mulf %35, %44 : vector<8x128xbf16>
    %cst_21 = arith.constant dense<0.000000e+00> : vector<8x8xf32>
    %46 = tpu.matmul %45, %37, %cst_21 {dimension_numbers = #tpu.dot_dimension_numbers<[1], [1], [0], [0], [0, 0, 1, 0], [], []>} : vector<8x128xbf16>, vector<8x128xbf16>, vector<8x8xf32> -> vector<8x8xf32>
    %47 = arith.addf %46, %40 : vector<8x8xf32>
    %cst_22 = arith.constant dense<0xFF800000> : vector<8xf32>
    %48 = vector.multi_reduction <maximumf>, %47, %cst_22 [1] : vector<8x8xf32> to vector<8xf32>
    %49 = vector.shape_cast %48 : vector<8xf32> to vector<8x1xf32>
    %50 = vector.broadcast %49 : vector<8x1xf32> to vector<8x8xf32>
    %51 = arith.subf %47, %50 : vector<8x8xf32>
    %52 = math.exp %51 : vector<8x8xf32>
    %cst_23 = arith.constant dense<0.000000e+00> : vector<8xf32>
    %53 = vector.multi_reduction <add>, %52, %cst_23 [1] : vector<8x8xf32> to vector<8xf32>
    %54 = vector.shape_cast %53 : vector<8xf32> to vector<8x1xf32>
    %55 = tpu.reciprocal %54 {approx = true} : vector<8x1xf32> -> vector<8x1xf32>
    %56 = vector.broadcast %55 : vector<8x1xf32> to vector<8x8xf32>
    %57 = arith.mulf %52, %56 : vector<8x8xf32>
    %58 = arith.truncf %57 : vector<8x8xf32> to vector<8x8xbf16>
    %59 = vector.broadcast %43 : vector<1x128xbf16> to vector<8x128xbf16>
    %60 = arith.mulf %39, %59 : vector<8x128xbf16>
    %cst_24 = arith.constant dense<0.000000e+00> : vector<8x128xf32>
    %61 = tpu.matmul %58, %60, %cst_24 {dimension_numbers = #tpu.dot_dimension_numbers<[1], [0], [0], [1], [0, 0, 1, 1], [], []>} : vector<8x8xbf16>, vector<8x128xbf16>, vector<8x128xf32> -> vector<8x128xf32>
    %62 = arith.addf %41, %61 : vector<8x128xf32>
    %c1 = arith.constant 1 : index
    %c0_25 = arith.constant 0 : index
    %63 = vector.load %arg3[%c1, %c0_25] : memref<4x128xf32, #tpu.memory_space<vmem>>, vector<1x128xf32>
    %64 = arith.truncf %63 : vector<1x128xf32> to vector<1x128xbf16>
    %65 = vector.broadcast %64 : vector<1x128xbf16> to vector<8x128xbf16>
    %66 = arith.mulf %35, %65 : vector<8x128xbf16>
    %cst_26 = arith.constant dense<0.000000e+00> : vector<8x8xf32>
    %67 = tpu.matmul %66, %37, %cst_26 {dimension_numbers = #tpu.dot_dimension_numbers<[1], [1], [0], [0], [0, 0, 1, 0], [], []>} : vector<8x128xbf16>, vector<8x128xbf16>, vector<8x8xf32> -> vector<8x8xf32>
    %68 = arith.addf %67, %40 : vector<8x8xf32>
    %cst_27 = arith.constant dense<0xFF800000> : vector<8xf32>
    %69 = vector.multi_reduction <maximumf>, %68, %cst_27 [1] : vector<8x8xf32> to vector<8xf32>
    %70 = vector.shape_cast %69 : vector<8xf32> to vector<8x1xf32>
    %71 = vector.broadcast %70 : vector<8x1xf32> to vector<8x8xf32>
    %72 = arith.subf %68, %71 : vector<8x8xf32>
    %73 = math.exp %72 : vector<8x8xf32>
    %cst_28 = arith.constant dense<0.000000e+00> : vector<8xf32>
    %74 = vector.multi_reduction <add>, %73, %cst_28 [1] : vector<8x8xf32> to vector<8xf32>
    %75 = vector.shape_cast %74 : vector<8xf32> to vector<8x1xf32>
    %76 = tpu.reciprocal %75 {approx = true} : vector<8x1xf32> -> vector<8x1xf32>
    %77 = vector.broadcast %76 : vector<8x1xf32> to vector<8x8xf32>
    %78 = arith.mulf %73, %77 : vector<8x8xf32>
    %79 = arith.truncf %78 : vector<8x8xf32> to vector<8x8xbf16>
    %80 = vector.broadcast %64 : vector<1x128xbf16> to vector<8x128xbf16>
    %81 = arith.mulf %39, %80 : vector<8x128xbf16>
    %cst_29 = arith.constant dense<0.000000e+00> : vector<8x128xf32>
    %82 = tpu.matmul %79, %81, %cst_29 {dimension_numbers = #tpu.dot_dimension_numbers<[1], [0], [0], [1], [0, 0, 1, 1], [], []>} : vector<8x8xbf16>, vector<8x128xbf16>, vector<8x128xf32> -> vector<8x128xf32>
    %83 = arith.addf %62, %82 : vector<8x128xf32>
    %c2 = arith.constant 2 : index
    %c0_30 = arith.constant 0 : index
    %84 = vector.load %arg3[%c2, %c0_30] : memref<4x128xf32, #tpu.memory_space<vmem>>, vector<1x128xf32>
    %85 = arith.truncf %84 : vector<1x128xf32> to vector<1x128xbf16>
    %86 = vector.broadcast %85 : vector<1x128xbf16> to vector<8x128xbf16>
    %87 = arith.mulf %35, %86 : vector<8x128xbf16>
    %cst_31 = arith.constant dense<0.000000e+00> : vector<8x8xf32>
    %88 = tpu.matmul %87, %37, %cst_31 {dimension_numbers = #tpu.dot_dimension_numbers<[1], [1], [0], [0], [0, 0, 1, 0], [], []>} : vector<8x128xbf16>, vector<8x128xbf16>, vector<8x8xf32> -> vector<8x8xf32>
    %89 = arith.addf %88, %40 : vector<8x8xf32>
    %cst_32 = arith.constant dense<0xFF800000> : vector<8xf32>
    %90 = vector.multi_reduction <maximumf>, %89, %cst_32 [1] : vector<8x8xf32> to vector<8xf32>
    %91 = vector.shape_cast %90 : vector<8xf32> to vector<8x1xf32>
    %92 = vector.broadcast %91 : vector<8x1xf32> to vector<8x8xf32>
    %93 = arith.subf %89, %92 : vector<8x8xf32>
    %94 = math.exp %93 : vector<8x8xf32>
    %cst_33 = arith.constant dense<0.000000e+00> : vector<8xf32>
    %95 = vector.multi_reduction <add>, %94, %cst_33 [1] : vector<8x8xf32> to vector<8xf32>
    %96 = vector.shape_cast %95 : vector<8xf32> to vector<8x1xf32>
    %97 = tpu.reciprocal %96 {approx = true} : vector<8x1xf32> -> vector<8x1xf32>
    %98 = vector.broadcast %97 : vector<8x1xf32> to vector<8x8xf32>
    %99 = arith.mulf %94, %98 : vector<8x8xf32>
    %100 = arith.truncf %99 : vector<8x8xf32> to vector<8x8xbf16>
    %101 = vector.broadcast %85 : vector<1x128xbf16> to vector<8x128xbf16>
    %102 = arith.mulf %39, %101 : vector<8x128xbf16>
    %cst_34 = arith.constant dense<0.000000e+00> : vector<8x128xf32>
    %103 = tpu.matmul %100, %102, %cst_34 {dimension_numbers = #tpu.dot_dimension_numbers<[1], [0], [0], [1], [0, 0, 1, 1], [], []>} : vector<8x8xbf16>, vector<8x128xbf16>, vector<8x128xf32> -> vector<8x128xf32>
    %104 = arith.addf %83, %103 : vector<8x128xf32>
    %c3 = arith.constant 3 : index
    %c0_35 = arith.constant 0 : index
    %105 = vector.load %arg3[%c3, %c0_35] : memref<4x128xf32, #tpu.memory_space<vmem>>, vector<1x128xf32>
    %106 = arith.truncf %105 : vector<1x128xf32> to vector<1x128xbf16>
    %107 = vector.broadcast %106 : vector<1x128xbf16> to vector<8x128xbf16>
    %108 = arith.mulf %35, %107 : vector<8x128xbf16>
    %cst_36 = arith.constant dense<0.000000e+00> : vector<8x8xf32>
    %109 = tpu.matmul %108, %37, %cst_36 {dimension_numbers = #tpu.dot_dimension_numbers<[1], [1], [0], [0], [0, 0, 1, 0], [], []>} : vector<8x128xbf16>, vector<8x128xbf16>, vector<8x8xf32> -> vector<8x8xf32>
    %110 = arith.addf %109, %40 : vector<8x8xf32>
    %cst_37 = arith.constant dense<0xFF800000> : vector<8xf32>
    %111 = vector.multi_reduction <maximumf>, %110, %cst_37 [1] : vector<8x8xf32> to vector<8xf32>
    %112 = vector.shape_cast %111 : vector<8xf32> to vector<8x1xf32>
    %113 = vector.broadcast %112 : vector<8x1xf32> to vector<8x8xf32>
    %114 = arith.subf %110, %113 : vector<8x8xf32>
    %115 = math.exp %114 : vector<8x8xf32>
    %cst_38 = arith.constant dense<0.000000e+00> : vector<8xf32>
    %116 = vector.multi_reduction <add>, %115, %cst_38 [1] : vector<8x8xf32> to vector<8xf32>
    %117 = vector.shape_cast %116 : vector<8xf32> to vector<8x1xf32>
    %118 = tpu.reciprocal %117 {approx = true} : vector<8x1xf32> -> vector<8x1xf32>
    %119 = vector.broadcast %118 : vector<8x1xf32> to vector<8x8xf32>
    %120 = arith.mulf %115, %119 : vector<8x8xf32>
    %121 = arith.truncf %120 : vector<8x8xf32> to vector<8x8xbf16>
    %122 = vector.broadcast %106 : vector<1x128xbf16> to vector<8x128xbf16>
    %123 = arith.mulf %39, %122 : vector<8x128xbf16>
    %cst_39 = arith.constant dense<0.000000e+00> : vector<8x128xf32>
    %124 = tpu.matmul %121, %123, %cst_39 {dimension_numbers = #tpu.dot_dimension_numbers<[1], [0], [0], [1], [0, 0, 1, 1], [], []>} : vector<8x8xbf16>, vector<8x128xbf16>, vector<8x128xf32> -> vector<8x128xf32>
    %125 = arith.addf %104, %124 : vector<8x128xf32>
    %126 = arith.truncf %125 : vector<8x128xf32> to vector<8x128xbf16>
    %c0_40 = arith.constant 0 : index
    %c0_41 = arith.constant 0 : index
    %c0_42 = arith.constant 0 : index
    %127 = vector.load %arg8[%c0_40, %c0_41, %c0_42] : memref<1x128x128xbf16, #tpu.memory_space<vmem>>, vector<1x128x128xbf16>
    %128 = vector.shape_cast %127 : vector<1x128x128xbf16> to vector<128x128xbf16>
    %cst_43 = arith.constant dense<0.000000e+00> : vector<8x128xf32>
    %129 = tpu.matmul %126, %128, %cst_43 {dimension_numbers = #tpu.dot_dimension_numbers<[1], [0], [0], [1], [0, 0, 1, 1], [], []>} : vector<8x128xbf16>, vector<128x128xbf16>, vector<8x128xf32> -> vector<8x128xf32>
    %c0_44 = arith.constant 0 : index
    %c0_45 = arith.constant 0 : index
    %c0_46 = arith.constant 0 : index
    %130 = vector.load %arg9[%c0_44, %c0_45, %c0_46] : memref<1x1x128xf32, #tpu.memory_space<vmem>>, vector<1x1x128xf32>
    %131 = vector.shape_cast %130 : vector<1x1x128xf32> to vector<1x128xf32>
    %132 = vector.broadcast %131 : vector<1x128xf32> to vector<8x128xf32>
    %133 = arith.addf %129, %132 : vector<8x128xf32>
    %134 = arith.addf %3, %133 : vector<8x128xf32>
    %c0_47 = arith.constant 0 : index
    %c0_48 = arith.constant 0 : index
    %c0_49 = arith.constant 0 : index
    %135 = vector.load %arg10[%c0_47, %c0_48, %c0_49] : memref<1x1x128xf32, #tpu.memory_space<vmem>>, vector<1x1x128xf32>
    %136 = vector.shape_cast %135 : vector<1x1x128xf32> to vector<1x128xf32>
    %c0_50 = arith.constant 0 : index
    %c0_51 = arith.constant 0 : index
    %c0_52 = arith.constant 0 : index
    %137 = vector.load %arg11[%c0_50, %c0_51, %c0_52] : memref<1x1x128xf32, #tpu.memory_space<vmem>>, vector<1x1x128xf32>
    %138 = vector.shape_cast %137 : vector<1x1x128xf32> to vector<1x128xf32>
    %cst_53 = arith.constant dense<0.000000e+00> : vector<8xf32>
    %139 = vector.multi_reduction <add>, %134, %cst_53 [1] : vector<8x128xf32> to vector<8xf32>
    %140 = vector.shape_cast %139 : vector<8xf32> to vector<8x1xf32>
    %cst_54 = arith.constant 1.280000e+02 : f32
    %141 = vector.broadcast %cst_54 : f32 to vector<8x1xf32>
    %142 = arith.divf %140, %141 : vector<8x1xf32>
    %143 = arith.mulf %134, %134 : vector<8x128xf32>
    %cst_55 = arith.constant dense<0.000000e+00> : vector<8xf32>
    %144 = vector.multi_reduction <add>, %143, %cst_55 [1] : vector<8x128xf32> to vector<8xf32>
    %145 = vector.shape_cast %144 : vector<8xf32> to vector<8x1xf32>
    %cst_56 = arith.constant 1.280000e+02 : f32
    %146 = vector.broadcast %cst_56 : f32 to vector<8x1xf32>
    %147 = arith.divf %145, %146 : vector<8x1xf32>
    %148 = arith.mulf %142, %142 : vector<8x1xf32>
    %149 = arith.subf %147, %148 : vector<8x1xf32>
    %150 = vector.broadcast %142 : vector<8x1xf32> to vector<8x128xf32>
    %151 = arith.subf %134, %150 : vector<8x128xf32>
    %cst_57 = arith.constant 9.99999974E-6 : f32
    %152 = vector.broadcast %cst_57 : f32 to vector<8x1xf32>
    %153 = arith.addf %149, %152 : vector<8x1xf32>
    %154 = math.rsqrt %153 : vector<8x1xf32>
    %155 = vector.broadcast %154 : vector<8x1xf32> to vector<8x128xf32>
    %156 = arith.mulf %151, %155 : vector<8x128xf32>
    %157 = vector.broadcast %136 : vector<1x128xf32> to vector<8x128xf32>
    %158 = arith.mulf %157, %156 : vector<8x128xf32>
    %159 = vector.broadcast %138 : vector<1x128xf32> to vector<8x128xf32>
    %160 = arith.addf %158, %159 : vector<8x128xf32>
    %161 = arith.truncf %160 : vector<8x128xf32> to vector<8x128xbf16>
    %c0_58 = arith.constant 0 : index
    %c0_59 = arith.constant 0 : index
    %c0_60 = arith.constant 0 : index
    %162 = vector.load %arg12[%c0_58, %c0_59, %c0_60] : memref<1x128x512xbf16, #tpu.memory_space<vmem>>, vector<1x128x512xbf16>
    %163 = vector.shape_cast %162 : vector<1x128x512xbf16> to vector<128x512xbf16>
    %cst_61 = arith.constant dense<0.000000e+00> : vector<8x512xf32>
    %164 = tpu.matmul %161, %163, %cst_61 {dimension_numbers = #tpu.dot_dimension_numbers<[1], [0], [0], [1], [0, 0, 1, 1], [], []>} : vector<8x128xbf16>, vector<128x512xbf16>, vector<8x512xf32> -> vector<8x512xf32>
    %c0_62 = arith.constant 0 : index
    %c0_63 = arith.constant 0 : index
    %c0_64 = arith.constant 0 : index
    %165 = vector.load %arg13[%c0_62, %c0_63, %c0_64] : memref<1x1x512xf32, #tpu.memory_space<vmem>>, vector<1x1x512xf32>
    %166 = vector.shape_cast %165 : vector<1x1x512xf32> to vector<1x512xf32>
    %167 = vector.broadcast %166 : vector<1x512xf32> to vector<8x512xf32>
    %168 = arith.addf %164, %167 : vector<8x512xf32>
    %cst_65 = arith.constant 5.000000e-01 : f32
    %169 = vector.broadcast %cst_65 : f32 to vector<8x512xf32>
    %170 = arith.mulf %169, %168 : vector<8x512xf32>
    %cst_66 = arith.constant 4.471500e-02 : f32
    %171 = vector.broadcast %cst_66 : f32 to vector<8x512xf32>
    %172 = arith.mulf %171, %168 : vector<8x512xf32>
    %173 = arith.mulf %172, %168 : vector<8x512xf32>
    %174 = arith.mulf %173, %168 : vector<8x512xf32>
    %175 = arith.addf %168, %174 : vector<8x512xf32>
    %cst_67 = arith.constant 0.797884583 : f32
    %176 = vector.broadcast %cst_67 : f32 to vector<8x512xf32>
    %177 = arith.mulf %176, %175 : vector<8x512xf32>
    %178 = math.tanh %177 : vector<8x512xf32>
    %cst_68 = arith.constant 1.000000e+00 : f32
    %179 = vector.broadcast %cst_68 : f32 to vector<8x512xf32>
    %180 = arith.addf %179, %178 : vector<8x512xf32>
    %181 = arith.mulf %170, %180 : vector<8x512xf32>
    %182 = arith.truncf %181 : vector<8x512xf32> to vector<8x512xbf16>
    %c0_69 = arith.constant 0 : index
    %c0_70 = arith.constant 0 : index
    %c0_71 = arith.constant 0 : index
    %183 = vector.load %arg14[%c0_69, %c0_70, %c0_71] : memref<1x512x128xbf16, #tpu.memory_space<vmem>>, vector<1x512x128xbf16>
    %184 = vector.shape_cast %183 : vector<1x512x128xbf16> to vector<512x128xbf16>
    %cst_72 = arith.constant dense<0.000000e+00> : vector<8x128xf32>
    %185 = tpu.matmul %182, %184, %cst_72 {dimension_numbers = #tpu.dot_dimension_numbers<[1], [0], [0], [1], [0, 0, 1, 1], [], []>} : vector<8x512xbf16>, vector<512x128xbf16>, vector<8x128xf32> -> vector<8x128xf32>
    %c0_73 = arith.constant 0 : index
    %c0_74 = arith.constant 0 : index
    %c0_75 = arith.constant 0 : index
    %186 = vector.load %arg15[%c0_73, %c0_74, %c0_75] : memref<1x1x128xf32, #tpu.memory_space<vmem>>, vector<1x1x128xf32>
    %187 = vector.shape_cast %186 : vector<1x1x128xf32> to vector<1x128xf32>
    %188 = vector.broadcast %187 : vector<1x128xf32> to vector<8x128xf32>
    %189 = arith.addf %185, %188 : vector<8x128xf32>
    %190 = arith.addf %134, %189 : vector<8x128xf32>
    %c0_76 = arith.constant 0 : index
    %c0_77 = arith.constant 0 : index
    %191 = vector.load %arg19[%c0_76, %c0_77] : memref<8x128xf32, #tpu.memory_space<vmem>>, vector<8x128xf32>
    tpu.vector_store %arg19[%c0_76, %c0_77], %190 {strides = array<i32>} : memref<8x128xf32, #tpu.memory_space<vmem>>, vector<8x128xf32>,
    %c1_i32 = arith.constant 1 : i32
    %192 = arith.cmpi eq, %arg1, %c1_i32 : i32
    %193 = arith.extui %192 : i1 to i32
    %c0_i32_78 = arith.constant 0 : i32
    %194 = arith.cmpi ne, %193, %c0_i32_78 : i32
    scf.if %194 {
      %c0_79 = arith.constant 0 : index
      %c0_80 = arith.constant 0 : index
      %195 = vector.load %arg16[%c0_79, %c0_80] : memref<1x128xf32, #tpu.memory_space<vmem>>, vector<1x128xf32>
      %c0_81 = arith.constant 0 : index
      %c0_82 = arith.constant 0 : index
      %196 = vector.load %arg17[%c0_81, %c0_82] : memref<1x128xf32, #tpu.memory_space<vmem>>, vector<1x128xf32>
      %cst_83 = arith.constant dense<0.000000e+00> : vector<8xf32>
      %197 = vector.multi_reduction <add>, %190, %cst_83 [1] : vector<8x128xf32> to vector<8xf32>
      %198 = vector.shape_cast %197 : vector<8xf32> to vector<8x1xf32>
      %cst_84 = arith.constant 1.280000e+02 : f32
      %199 = vector.broadcast %cst_84 : f32 to vector<8x1xf32>
      %200 = arith.divf %198, %199 : vector<8x1xf32>
      %201 = arith.mulf %190, %190 : vector<8x128xf32>
      %cst_85 = arith.constant dense<0.000000e+00> : vector<8xf32>
      %202 = vector.multi_reduction <add>, %201, %cst_85 [1] : vector<8x128xf32> to vector<8xf32>
      %203 = vector.shape_cast %202 : vector<8xf32> to vector<8x1xf32>
      %cst_86 = arith.constant 1.280000e+02 : f32
      %204 = vector.broadcast %cst_86 : f32 to vector<8x1xf32>
      %205 = arith.divf %203, %204 : vector<8x1xf32>
      %206 = arith.mulf %200, %200 : vector<8x1xf32>
      %207 = arith.subf %205, %206 : vector<8x1xf32>
      %208 = vector.broadcast %200 : vector<8x1xf32> to vector<8x128xf32>
      %209 = arith.subf %190, %208 : vector<8x128xf32>
      %cst_87 = arith.constant 9.99999974E-6 : f32
      %210 = vector.broadcast %cst_87 : f32 to vector<8x1xf32>
      %211 = arith.addf %207, %210 : vector<8x1xf32>
      %212 = math.rsqrt %211 : vector<8x1xf32>
      %213 = vector.broadcast %212 : vector<8x1xf32> to vector<8x128xf32>
      %214 = arith.mulf %209, %213 : vector<8x128xf32>
      %215 = vector.broadcast %195 : vector<1x128xf32> to vector<8x128xf32>
      %216 = arith.mulf %215, %214 : vector<8x128xf32>
      %217 = vector.broadcast %196 : vector<1x128xf32> to vector<8x128xf32>
      %218 = arith.addf %216, %217 : vector<8x128xf32>
      %c0_88 = arith.constant 0 : index
      %c0_89 = arith.constant 0 : index
      %c0_90 = arith.constant 0 : index
      %219 = vector.load %arg18[%c0_88, %c0_89, %c0_90] : memref<1x8x128xf32, #tpu.memory_space<vmem>>, vector<1x8x128xf32>
      %220 = vector.shape_cast %219 : vector<1x8x128xf32> to vector<8x128xf32>
      %221 = vector.shape_cast %218 : vector<8x128xf32> to vector<1x8x128xf32>
      tpu.vector_store %arg18[%c0_88, %c0_89, %c0_90], %221 {strides = array<i32>} : memref<1x8x128xf32, #tpu.memory_space<vmem>>, vector<1x8x128xf32>,
    } else {
    }
    return
  }
  func.func @transform_0(%arg0: i32, %arg1: i32) -> (i32, i32) {
    %c0_i32 = arith.constant 0 : i32
    %c0_i32_0 = arith.constant 0 : i32
    %c0_i32_1 = arith.constant 0 : i32
    return %c0_i32, %c0_i32_0 : i32, i32
  }
  func.func @transform_1(%arg0: i32, %arg1: i32) -> (i32, i32) {
    %c0_i32 = arith.constant 0 : i32
    %c0_i32_0 = arith.constant 0 : i32
    %c0_i32_1 = arith.constant 0 : i32
    return %c0_i32, %c0_i32_0 : i32, i32
  }
  func.func @transform_2(%arg0: i32, %arg1: i32) -> (i32, i32, i32) {
    %c0_i32 = arith.constant 0 : i32
    %c0_i32_0 = arith.constant 0 : i32
    %c0_i32_1 = arith.constant 0 : i32
    return %arg0, %c0_i32, %c0_i32_0 : i32, i32, i32
  }
  func.func @transform_3(%arg0: i32, %arg1: i32) -> (i32, i32, i32) {
    %c0_i32 = arith.constant 0 : i32
    %c0_i32_0 = arith.constant 0 : i32
    %c0_i32_1 = arith.constant 0 : i32
    return %arg1, %c0_i32, %c0_i32_0 : i32, i32, i32
  }
  func.func @transform_4(%arg0: i32, %arg1: i32) -> (i32, i32, i32) {
    %c0_i32 = arith.constant 0 : i32
    %c0_i32_0 = arith.constant 0 : i32
    %c0_i32_1 = arith.constant 0 : i32
    return %arg1, %c0_i32, %c0_i32_0 : i32, i32, i32
  }
  func.func @transform_5(%arg0: i32, %arg1: i32) -> (i32, i32, i32) {
    %c0_i32 = arith.constant 0 : i32
    %c0_i32_0 = arith.constant 0 : i32
    %c0_i32_1 = arith.constant 0 : i32
    return %arg1, %c0_i32, %c0_i32_0 : i32, i32, i32
  }
  func.func @transform_6(%arg0: i32, %arg1: i32) -> (i32, i32, i32) {
    %c0_i32 = arith.constant 0 : i32
    %c0_i32_0 = arith.constant 0 : i32
    %c0_i32_1 = arith.constant 0 : i32
    return %arg1, %c0_i32, %c0_i32_0 : i32, i32, i32
  }
  func.func @transform_7(%arg0: i32, %arg1: i32) -> (i32, i32, i32) {
    %c0_i32 = arith.constant 0 : i32
    %c0_i32_0 = arith.constant 0 : i32
    %c0_i32_1 = arith.constant 0 : i32
    return %arg1, %c0_i32, %c0_i32_0 : i32, i32, i32
  }
  func.func @transform_8(%arg0: i32, %arg1: i32) -> (i32, i32, i32) {
    %c0_i32 = arith.constant 0 : i32
    %c0_i32_0 = arith.constant 0 : i32
    %c0_i32_1 = arith.constant 0 : i32
    return %arg1, %c0_i32, %c0_i32_0 : i32, i32, i32
  }
  func.func @transform_9(%arg0: i32, %arg1: i32) -> (i32, i32, i32) {
    %c0_i32 = arith.constant 0 : i32
    %c0_i32_0 = arith.constant 0 : i32
    %c0_i32_1 = arith.constant 0 : i32
    return %arg1, %c0_i32, %c0_i32_0 : i32, i32, i32
  }
  func.func @transform_10(%arg0: i32, %arg1: i32) -> (i32, i32, i32) {
    %c0_i32 = arith.constant 0 : i32
    %c0_i32_0 = arith.constant 0 : i32
    %c0_i32_1 = arith.constant 0 : i32
    return %arg1, %c0_i32, %c0_i32_0 : i32, i32, i32
  }
  func.func @transform_11(%arg0: i32, %arg1: i32) -> (i32, i32, i32) {
    %c0_i32 = arith.constant 0 : i32
    %c0_i32_0 = arith.constant 0 : i32
    %c0_i32_1 = arith.constant 0 : i32
    return %arg1, %c0_i32, %c0_i32_0 : i32, i32, i32
  }
  func.func @transform_12(%arg0: i32, %arg1: i32) -> (i32, i32, i32) {
    %c0_i32 = arith.constant 0 : i32
    %c0_i32_0 = arith.constant 0 : i32
    %c0_i32_1 = arith.constant 0 : i32
    return %arg1, %c0_i32, %c0_i32_0 : i32, i32, i32
  }
  func.func @transform_13(%arg0: i32, %arg1: i32) -> (i32, i32, i32) {
    %c0_i32 = arith.constant 0 : i32
    %c0_i32_0 = arith.constant 0 : i32
    %c0_i32_1 = arith.constant 0 : i32
    return %arg1, %c0_i32, %c0_i32_0 : i32, i32, i32
  }
  func.func @transform_14(%arg0: i32, %arg1: i32) -> (i32, i32) {
    %c0_i32 = arith.constant 0 : i32
    %c0_i32_0 = arith.constant 0 : i32
    %c0_i32_1 = arith.constant 0 : i32
    return %c0_i32, %c0_i32_0 : i32, i32
  }
  func.func @transform_15(%arg0: i32, %arg1: i32) -> (i32, i32) {
    %c0_i32 = arith.constant 0 : i32
    %c0_i32_0 = arith.constant 0 : i32
    %c0_i32_1 = arith.constant 0 : i32
    return %c0_i32, %c0_i32_0 : i32, i32
  }
  func.func @transform_16(%arg0: i32, %arg1: i32) -> (i32, i32, i32) {
    %c0_i32 = arith.constant 0 : i32
    %c0_i32_0 = arith.constant 0 : i32
    %c0_i32_1 = arith.constant 0 : i32
    return %arg0, %c0_i32, %c0_i32_0 : i32, i32, i32
  }
}

module attributes {stable_mosaic.version = 11 : i64} {
  func.func @lm_head_kernel(%arg0: i32, %arg1: memref<16x128xf32, #tpu.memory_space<vmem>>, %arg2: memref<128x128xbf16, #tpu.memory_space<vmem>>, %arg3: memref<16x128xf32, #tpu.memory_space<vmem>>) attributes {dimension_semantics = [#tpu.dimension_semantics<parallel>], iteration_bounds = array<i64: 2>, scalar_prefetch = 0 : i64, scratch_operands = 0 : i64, tpu.core_type = #tpu.core_type<tc>, window_params = [{pipeline_mode = #tpu.pipeline_mode<synchronous>, transform_indices = @transform_0, window_bounds = array<i64: 16, 128>}, {transform_indices = @transform_1, window_bounds = array<i64: 128, 128>}, {transform_indices = @transform_2, window_bounds = array<i64: 16, 128>}]} {
    %c0 = arith.constant 0 : index
    %c0_0 = arith.constant 0 : index
    %0 = vector.load %arg1[%c0, %c0_0] : memref<16x128xf32, #tpu.memory_space<vmem>>, vector<16x128xf32>
    %1 = arith.truncf %0 : vector<16x128xf32> to vector<16x128xbf16>
    %c0_1 = arith.constant 0 : index
    %c0_2 = arith.constant 0 : index
    %2 = vector.load %arg2[%c0_1, %c0_2] : memref<128x128xbf16, #tpu.memory_space<vmem>>, vector<128x128xbf16>
    %cst = arith.constant dense<0.000000e+00> : vector<16x128xf32>
    %3 = tpu.matmul %1, %2, %cst {dimension_numbers = #tpu.dot_dimension_numbers<[1], [0], [0], [1], [0, 0, 1, 1], [], []>} : vector<16x128xbf16>, vector<128x128xbf16>, vector<16x128xf32> -> vector<16x128xf32>
    %c0_3 = arith.constant 0 : index
    %c0_4 = arith.constant 0 : index
    %4 = vector.load %arg3[%c0_3, %c0_4] : memref<16x128xf32, #tpu.memory_space<vmem>>, vector<16x128xf32>
    tpu.vector_store %arg3[%c0_3, %c0_4], %3 {strides = array<i32>} : memref<16x128xf32, #tpu.memory_space<vmem>>, vector<16x128xf32>,
    return
  }
  func.func @transform_0(%arg0: i32) -> (i32, i32) {
    %c0_i32 = arith.constant 0 : i32
    %c0_i32_0 = arith.constant 0 : i32
    %c0_i32_1 = arith.constant 0 : i32
    return %c0_i32, %c0_i32_0 : i32, i32
  }
  func.func @transform_1(%arg0: i32) -> (i32, i32) {
    %c0_i32 = arith.constant 0 : i32
    %c0_i32_0 = arith.constant 0 : i32
    return %c0_i32, %arg0 : i32, i32
  }
  func.func @transform_2(%arg0: i32) -> (i32, i32) {
    %c0_i32 = arith.constant 0 : i32
    %c0_i32_0 = arith.constant 0 : i32
    return %c0_i32, %arg0 : i32, i32
  }
}

</mosaic_0001>

<bundles_post_ra>
// kernel: _lambda_.3
= control target key start
LH: loop header
LB: loop body
LE: loop exit
PB: predicated region body
PF: predicated region fallthrough
CT: control target
= control target key end

     0   :  { %7 = vsyncpa [#allocation4], 0  ;;  %s757_s0 = inlined_call_operand.vmem [shape: f32[16,128], index: 0, kind: input, shape index: {}]   ;;  %s758_s1 = inlined_call_operand.vmem [shape: bf16[128,256], index: 1, kind: input, shape index: {}]   ;;  %s759_s2 = inlined_call_operand.hbm [shape: f32[16,256], index: 2, kind: output, shape index: {}]  }
   0x1   :  { %9 = vsyncpa [#allocation4 + $0x1], 0  ;;  %s621_s9 = smov 0   ;;  %s623_s10 = smov 0  }
   0x2   :  { %s625_s11 = smov 0   ;;  %s627_s12 = smov 0  }
   0x3 LB: > { %s434_s13 = sadd.s32 4294967295, %s598_s12   ;;  %s435_s14 = sadd.s32 4294967294, %s598_s12   ;;  %s598_s12 = sphi %s627_s12, %s765_s12   ;;  %s594_s11 = sphi %s625_s11, %s764_s11   ;;  %s590_s10 = sphi %s623_s10, %s763_s10   ;;  %s586_s9 = sphi %s621_s9, %s762_s9  }
   0x4   : > { %s644_s15 = sadd.s32 1, %s598_s12   ;;  %s43_s16 = sadd.s32 1, %s594_s11 }
   0x5   : > { %s40_s17 = ssub.s32 %s598_s12, %s644_s15  ;;  %p50_p0 = scmp.ne.s32.totalorder %s594_s11, %s590_s10 }
   0x6   : > { %p41_p1 = scmp.eq.s32.totalorder %s40_s17, 0  ;;  %p51_p2 = scmp.eq.s32.totalorder %s598_s12, 0 }
   0x7   : > { %p80_p3 = scmp.eq.s32.totalorder %s434_s13, 1  ;;  %p85_p4 = scmp.ne.s32.totalorder %s590_s10, %s586_s9 }
   0x8   : > { %s657_s18 = scalar_select %p41_p1, %s594_s11, %s43_s16  }
   0x9   : > { %p52_p5 = por %p51_p2, %p50_p0  ;;  %p659_p6 = por %p80_p3, %p50_p0 }
   0xa   : > { %p86_p7 = scmp.eq.s32.totalorder %s435_s14, 1  ;;  %p437_p9 = scmp.ge.s32.totalorder %s598_s12, 2 }
   0xc   : > { %p663_p8 = por %p86_p7, %p85_p4  ;;  %105 = sbr.rel (%p437_p9) target bundleno = 33 (0x21), region = 20 }
  0x13   : > { %108 = sbr.rel (!%p52_p5) target bundleno = 33 (0x21), region = 24  ;;  %s110_s21 = sand.u32 (%p52_p5), 1, %s594_s11  }
  0x14   : > { %s439_s22 = sshll.u32 (%p52_p5), %s598_s12, 2  ;;  %s438_s23 = sshll.u32 (%p52_p5), %s110_s21, 6 }
  0x15   : > { %s675_s26 = scalar_lea.vmem (%p52_p5), %s758_s1, %s439_s22  ;;  %s112_s27 = scalar_lea.vmem (%p52_p5), [#allocation2], %s438_s23 }
  0x16   : > { %v130_v0 = vld [vmem:[%s675_s26] sm:$0xf] (%p52_p5)  ;;  %v132_v1 = vld [vmem:[%s675_s26 + $0x8] sm:$0xf] (%p52_p5)  ;;  %v134_v2 = vld [vmem:[%s675_s26 + $0x10] sm:$0xf] (%p52_p5) }
  0x17   : > { %131 = vst [vmem:[%s112_s27] sm:$0xf] (%p52_p5), %v130_v0  ;;  %133 = vst [vmem:[%s112_s27 + $0x4] sm:$0xf] (%p52_p5), %v132_v1  ;;  %v136_v3 = vld [vmem:[%s675_s26 + $0x18] sm:$0xf] (%p52_p5) }
  0x18   : > { %v138_v4 = vld [vmem:[%s675_s26 + $0x20] sm:$0xf] (%p52_p5)  ;;  %135 = vst [vmem:[%s112_s27 + $0x8] sm:$0xf] (%p52_p5), %v134_v2  ;;  %137 = vst [vmem:[%s112_s27 + $0xc] sm:$0xf] (%p52_p5), %v136_v3 }
  0x19   : > { %139 = vst [vmem:[%s112_s27 + $0x10] sm:$0xf] (%p52_p5), %v138_v4  ;;  %v140_v5 = vld [vmem:[%s675_s26 + $0x28] sm:$0xf] (%p52_p5)  ;;  %v142_v6 = vld [vmem:[%s675_s26 + $0x30] sm:$0xf] (%p52_p5) }
  0x1a   : > { %v144_v7 = vld [vmem:[%s675_s26 + $0x38] sm:$0xf]  ;;  %141 = vst [vmem:[%s112_s27 + $0x14] sm:$0xf] %v140_v5  ;;  %143 = vst [vmem:[%s112_s27 + $0x18] sm:$0xf] %v142_v6 }
  0x1b   : > { %145 = vst [vmem:[%s112_s27 + $0x1c] sm:$0xf] %v144_v7  ;;  %v146_v8 = vld [vmem:[%s675_s26 + $0x40] sm:$0xf]  ;;  %v148_v9 = vld [vmem:[%s675_s26 + $0x48] sm:$0xf] }
  0x1c   : > { %v150_v10 = vld [vmem:[%s675_s26 + $0x50] sm:$0xf]  ;;  %147 = vst [vmem:[%s112_s27 + $0x20] sm:$0xf] %v146_v8  ;;  %149 = vst [vmem:[%s112_s27 + $0x24] sm:$0xf] %v148_v9 }
  0x1d   : > { %151 = vst [vmem:[%s112_s27 + $0x28] sm:$0xf] %v150_v10  ;;  %v152_v11 = vld [vmem:[%s675_s26 + $0x58] sm:$0xf]  ;;  %v154_v12 = vld [vmem:[%s675_s26 + $0x60] sm:$0xf] }
  0x1e   : > { %v156_v13 = vld [vmem:[%s675_s26 + $0x68] sm:$0xf]  ;;  %153 = vst [vmem:[%s112_s27 + $0x2c] sm:$0xf] %v152_v11  ;;  %155 = vst [vmem:[%s112_s27 + $0x30] sm:$0xf] %v154_v12 }
  0x1f   : > { %157 = vst [vmem:[%s112_s27 + $0x34] sm:$0xf] %v156_v13  ;;  %v158_v14 = vld [vmem:[%s675_s26 + $0x70] sm:$0xf]  ;;  %v160_v15 = vld [vmem:[%s675_s26 + $0x78] sm:$0xf] }
  0x20   : > { %159 = vst [vmem:[%s112_s27 + $0x38] sm:$0xf] %v158_v14  ;;  %161 = vst [vmem:[%s112_s27 + $0x3c] sm:$0xf] %v160_v15 }
  0x21 PF: > { %p440_p10 = scmp.ge.s32.totalorder %s598_s12, 1  ;;  %p215_p11 = scmp.lt.s32.totalorder %s598_s12, 3 }
  0x23   : > { %p216_p12 = pnand %p440_p10, %p215_p11 }
  0x24   : > { %s696_s28 = sand.u32 (!%p216_p12), 1, %s590_s10   ;;  %v600_v16 = vmov (!%p216_p12), 0.0   ;;  %vm601_vm0 = vmmov (!%p216_p12), 0   ;;  %v244_v25 = vld [vmem:[%s757_s0] sm:$0xff] (!%p216_p12)  ;;  %v245_v26 = vld [vmem:[%s757_s0 + $0x8] sm:$0xff] (!%p216_p12)  ;;  %s452_s16 = sshll.u32 (!%p216_p12), %s434_s13, 7 }
  0x25   : > { %219 = sbr.rel (%p216_p12) target bundleno = 301 (0x12d), region = 65  ;;  %464 = vmatprep.subr.bf16.mxu0 (!%p216_p12), %v600_v16  ;;  %s441_s29 = sshll.u32 (!%p216_p12), %s696_s28, 6  ;;  %480 = vmatprep.mubr.msk.bf16.mxu0 (!%p216_p12), %vm601_vm0, %v600_v16  ;;  %v246_v27 = vpack.c.bf16 (!%p216_p12), %v245_v26, %v244_v25 }
  0x26   : > { %s224_s30 = scalar_lea.vmem (!%p216_p12), [#allocation2], %s441_s29  ;;  %s442_s7 = sshll.u32 (!%p216_p12), %s696_s28, 4 }
  0x27   : > { %v528_v17 = vld [vmem:[%s224_s30] sm:$0xff] (!%p216_p12)   ;;  %v529_v18 = vld [vmem:[%s224_s30 + $0x8] sm:$0xff] (!%p216_p12)   ;;  %v530_v19 = vld [vmem:[%s224_s30 + $0x10] sm:$0xff] (!%p216_p12)   ;;  %s242_s8 = scalar_lea.vmem (!%p216_p12), [#allocation3], %s442_s7  ;;  %s713_s22 = scalar_lea.hbm (!%p216_p12), %s759_s2, %s452_s16 }
  0x28   : > { %465 = vmatpush3.bf16.msra.mxu0 (!%p216_p12), %v528_v17  ;;  %v531_v20 = vld [vmem:[%s224_s30 + $0x18] sm:$0xff] (!%p216_p12)   ;;  %v532_v21 = vld [vmem:[%s224_s30 + $0x20] sm:$0xff] (!%p216_p12)   ;;  %v533_v22 = vld [vmem:[%s224_s30 + $0x28] sm:$0xff] (!%p216_p12)   ;;  %s367_s14 = sshll.u32 (!%p216_p12), %s242_s8, 4  ;;  %s355_s23 = scalar_lea.sflag (!%p216_p12), [#allocation4], %s696_s28  ;;  %s708_s14 = int_to_ptr.vmem [resolvable:$true] %s367_s14 }
  0x29   : > { %466 = vmatprep.subr.bf16.mxu0 (!%p216_p12), %v600_v16  ;;  %v534_v23 = vld [vmem:[%s224_s30 + $0x30] sm:$0xff] (!%p216_p12)   ;;  %v535_v24 = vld [vmem:[%s224_s30 + $0x38] sm:$0xff] (!%p216_p12)   ;;  %s536_s24 = scalar_lea.vmem (!%p216_p12), %s708_s14, 256  ;;  %s602_s13 = smov (!%p216_p12), [#allocation3]  }
  0x2a   : > { %p537_p13 = scmp.ne.s32.totalorder (!%p216_p12), %s708_s14, %s536_s24  ;;  %s540_s25 = sshll.u32 (!%p216_p12), %s602_s13, 4  ;;  %s541_s25 = int_to_ptr.vmem [resolvable:$false] %s540_s25 }
  0x2b   : > { %s542_s26 = scalar_lea.vmem (!%p216_p12), %s541_s25, 512  ;;  %p543_p2 = scmp.lt.s32.totalorder (!%p216_p12), %s708_s14, %s541_s25 }
  0x2c   : > { %467 = vmatpush3.bf16.msra.mxu0 %v529_v18  ;;  %p538_p0 = pnand %p537_p13, %p659_p6  ;;  %p544_p3 = scmp.lt.s32.totalorder %s542_s26, %s536_s24 }
  0x2d   : > { %468 = vmatprep.subr.bf16.mxu0 %v600_v16 }
  0x2e   : > { %p539_p1 = pneg %p538_p0  ;;  %p545_p4 = por %p544_p3, %p543_p2 }
  0x30   : > { %469 = vmatpush3.bf16.msra.mxu0 %v530_v19  ;;  %p546_p5 = pnand %p545_p4, %p539_p1 }
  0x31   : > { %470 = vmatprep.subr.bf16.mxu0 %v600_v16 }
  0x34   : > { %471 = vmatpush3.bf16.msra.mxu0 %v531_v20 }
  0x35   : > { %472 = vmatprep.subr.bf16.mxu0 %v600_v16 }
  0x38   : > { %473 = vmatpush3.bf16.msra.mxu0 %v532_v21 }
  0x39   : > { %474 = vmatprep.subr.bf16.mxu0 %v600_v16 }
  0x3c   : > { %475 = vmatpush3.bf16.msra.mxu0 %v533_v22 }
  0x3d   : > { %476 = vmatprep.subr.bf16.mxu0 %v600_v16 }
  0x40   : > { %477 = vmatpush3.bf16.msra.mxu0 %v534_v23 }
  0x41   : > { %478 = vmatprep.subr.bf16.mxu0 %v600_v16 }
  0x44   : > { %479 = vmatpush3.bf16.msra.mxu0 %v535_v24 }
  0x47   : > { %481 = vmatmul.mubr.bf16.vlgmr.msra.gmra.mrb[0].mxu0 %v246_v27 }
 0x11a   : > { %v345_v28 = vpop.f32.mrb[0].mxu0 }
 0x11b   : > { %352 = vst [vmem:[%s242_s8] sm:$0xff] %v345_v28  ;;  %v482_v29 = vpop.f32.mrb[1].mxu0 }
 0x11c   : > { %v348_v30 = vpop.f32.mrb[2].mxu0 }
 0x11d   : > { %353 = vst [vmem:[%s242_s8 + $0x8] sm:$0xff] %v348_v30  ;;  %v483_v31 = vpop.f32.mrb[3].mxu0 }
 0x11e   : > { %549 = shalt.err (!%p546_p5)
}
 0x11f   : > { %s550_s27 = scalar_lea.hbm %s713_s22, 256  ;;  %s554_s3 = scalar_lea.hbm %s759_s2, 512 }
 0x120   : > { %p551_p7 = scmp.ne.s32.totalorder %s713_s22, %s550_s27  ;;  %p555_p12 = scmp.lt.u32.totalorder %s713_s22, %s759_s2 }
 0x121   : > { %p556_p13 = scmp.lt.u32.totalorder %s554_s3, %s550_s27  ;;  %p558_p1 = scmp.lt.u32.totalorder %s550_s27, %s713_s22 }
 0x122   : > { %p552_p10 = pnand %p551_p7, %p659_p6 }
 0x123   : > { %p557_p0 = por %p556_p13, %p555_p12 }
 0x124   : > { %p553_p11 = pneg %p552_p10 }
 0x125   : > { %p559_p2 = por %p558_p1, %p557_p0 }
 0x127   : > { %p560_p3 = pnand %p559_p2, %p553_p11 }
 0x129   : > { %563 = shalt.err (!%p560_p3)
}
 0x12a   : > { %s603_s6 = smov 128   ;;  %s604_s7 = smov 256  }
 0x12b   : > { %s605_s8 = smov 8  }
 0x12c   : > { %484 = dma.vmem_to_hbm [thread:$0]  (%p659_p6), %s708_s14, 256, %s713_s22, %s355_s23, %s603_s6, %s604_s7, %s605_s8  }
 0x12d PF: > { %s382_s16 = sand.u32 1, %s586_s9   ;;  %p487_p4 = pnand %p437_p9, %p663_p8 }
 0x12e   : > { %s383_s17 = scalar_lea.sflag [#allocation4], %s382_s16 }
 0x12f   : > { %581 = dma.done.wait (!%p487_p4), %s383_s17, 256  }
 0x130   : > { %583 = vsyncadd (!%p487_p4), %s383_s17, 4294967040  ;;  %p12_p5 = scmp.ge.s32.totalorder %s644_s15, 4   ;;  %s762_s9 = smov %s590_s10 }
 0x131   : > { %s763_s10 = smov %s594_s11  ;;  %s764_s11 = smov %s657_s18 }
 0x132   : > { %s765_s12 = smov %s644_s15  ;;  %14 = sbr.rel (!%p12_p5) target bundleno = 3 (0x3), region = 109 }
 0x139   :  { %388 = vsyncpa [#allocation4], 1 }
 0x13a   :  { %390 = vsyncpa [#allocation4 + $0x1], 1 }

// kernel: _lambda_.2
= control target key start
LH: loop header
LB: loop body
LE: loop exit
PB: predicated region body
PF: predicated region fallthrough
CT: control target
= control target key end

     0   :  { %s3906_s0 = inlined_call_operand.vmem [shape: f32[8,8], index: 0, kind: input, shape index: {}]   ;;  %s3907_s1 = inlined_call_operand.vmem [shape: f32[4,128], index: 1, kind: input, shape index: {}]   ;;  %s3908_s2 = inlined_call_operand.vmem [shape: f32[2,8,128], index: 2, kind: input, shape index: {}]   ;;  %s3909_s3 = inlined_call_operand.vmem [shape: f32[2,1,128], index: 3, kind: input, shape index: {}]   ;;  %s3910_s4 = inlined_call_operand.vmem [shape: f32[2,1,128], index: 4, kind: input, shape index: {}]   ;;  %s3911_s5 = inlined_call_operand.hbm [shape: bf16[2,128,384], index: 5, kind: input, shape index: {}]   ;;  %s3912_s6 = inlined_call_operand.vmem [shape: bf16[2,128,128], index: 6, kind: input, shape index: {}]   ;;  %s3913_s7 = inlined_call_operand.vmem [shape: f32[2,1,128], index: 7, kind: input, shape index: {}]   ;;  %s3914_s8 = inlined_call_operand.vmem [shape: f32[2,1,128], index: 8, kind: input, shape index: {}]   ;;  %s3915_s9 = inlined_call_operand.vmem [shape: f32[2,1,128], index: 9, kind: input, shape index: {}]   ;;  %s3916_s10 = inlined_call_operand.hbm [shape: bf16[2,128,512], index: 10, kind: input, shape index: {}]   ;;  %s3917_s11 = inlined_call_operand.vmem [shape: f32[2,1,512], index: 11, kind: input, shape index: {}]   ;;  %s3918_s12 = inlined_call_operand.hbm [shape: bf16[2,512,128], index: 12, kind: input, shape index: {}]   ;;  %s3919_s13 = inlined_call_operand.vmem [shape: f32[2,1,128], index: 13, kind: input, shape index: {}]   ;;  %s3920_s14 = inlined_call_operand.vmem [shape: f32[1,128], index: 14, kind: input, shape index: {}]   ;;  %s3921_s15 = inlined_call_operand.vmem [shape: f32[1,128], index: 15, kind: input, shape index: {}]   ;;  %s3922_s16 = inlined_call_operand.vmem [shape: f32[2,8,128], index: 16, kind: output, shape index: {}]  }
   0x1   :  { %3934 = sst [smem:[#allocation18_spill]] %s3906_s0 }
   0x2   :  { %3935 = sst [smem:[#allocation19_spill]] %s3907_s1 }
   0x3   :  { %3936 = sst [smem:[#allocation20_spill]] %s3908_s2 }
   0x4   :  { %3937 = sst [smem:[#allocation21_spill]] %s3911_s5 }
   0x5   :  { %3938 = sst [smem:[#allocation22_spill]] %s3912_s6 }
   0x6   :  { %3939 = sst [smem:[#allocation23_spill]] %s3913_s7 }
   0x7   :  { %3940 = sst [smem:[#allocation24_spill]] %s3915_s9 }
   0x8   :  { %3941 = sst [smem:[#allocation25_spill]] %s3916_s10 }
   0x9   :  { %3942 = sst [smem:[#allocation26_spill]] %s3917_s11 }
   0xa   :  { %3943 = sst [smem:[#allocation27_spill]] %s3918_s12 }
   0xb   :  { %3944 = sst [smem:[#allocation28_spill]] %s3919_s13 }
   0xc   :  { %3945 = sst [smem:[#allocation29_spill]] %s3920_s14 }
   0xd   :  { %3946 = sst [smem:[#allocation30_spill]] %s3921_s15 }
   0xe   :  { %3947 = sst [smem:[#allocation31_spill]] %s3922_s16 }
   0xf   :  { %21 = vsyncpa [#allocation4], 0 }
  0x10   :  { %23 = vsyncpa [#allocation4 + $0x1], 0 }
  0x11   :  { %24 = vsyncpa [#allocation6], 0 }
  0x12   :  { %26 = vsyncpa [#allocation6 + $0x1], 0  ;;  %s3372_s21 = smov 0   ;;  %s3374_s22 = smov 0  }
  0x13   :  { %s3376_s23 = smov 0   ;;  %s3378_s24 = smov 0  }
  0x14   :  { %s3380_s25 = smov 0   ;;  %s3382_s26 = smov 0  }
  0x15   :  { %s3384_s27 = smov 0   ;;  %s3386_s28 = smov 0  }
  0x16 LB: > { %3948 = sst [smem:[#allocation10_spill]] %s3249_s22  ;;  %s3925_s29 = sadd.s32 4294967295, %s3273_s28   ;;  %s3273_s28 = sphi %s3386_s28, %s32_s28   ;;  %s3269_s27 = sphi %s3384_s27, %s3992_s27   ;;  %s3265_s26 = sphi %s3382_s26, %s3991_s26   ;;  %s3261_s25 = sphi %s3380_s25, %s3990_s25   ;;  %s3257_s24 = sphi %s3378_s24, %s3989_s24   ;;  %s3253_s23 = sphi %s3376_s23, %s3988_s23   ;;  %s3249_s22 = sphi %s3374_s22, %s3987_s22   ;;  %s3245_s21 = sphi %s3372_s21, %s3986_s21  }
  0x17   : > { %3949 = sst [smem:[#allocation11_spill]] %s3253_s23  ;;  %s41_s30 = sadd.s32 1, %s3265_s26 }
  0x18   : > { %3950 = sst [smem:[#allocation12_spill]] %s3265_s26  ;;  %p42_p0 = scmp.ge.s32.totalorder %s41_s30, 2 }
  0x19   : > { %3951 = sst [smem:[#allocation13_spill]] %s3269_s27  ;;  %s44_s0 = sadd.s32 1, %s3269_s27 }
  0x1a   : > { %3952 = sst [smem:[#allocation14_spill]] %s3273_s28  ;;  %s171_s17 = sadd.s32 1, %s3253_s23 }
  0x1b   : > { %p178_p1 = scmp.ne.s32.totalorder %s3253_s23, %s3249_s22  ;;  %s3994_s30 = smov (%p42_p0, %s41_s30), 0 }
  0x1c   : > { %3953 = sst [smem:[#allocation15_spill]] %s3994_s30  ;;  %s3996_s0 = smov (!%p42_p0, %s44_s0), %s3269_s27 }
  0x1d   : > { %s168_s18 = ssub.s32 %s3265_s26, %s3994_s30  ;;  %p179_p2 = scmp.eq.s32.totalorder %s3273_s28, 0 }
  0x1e   : > { %p46_p3 = scmp.ge.s32.totalorder %s3996_s0, 2  ;;  %p169_p4 = scmp.eq.s32.totalorder %s168_s18, 0 }
  0x1f   : > { %p180_p5 = por %p179_p2, %p178_p1  ;;  %p184_p6 = scmp.ne.s32.totalorder %s3249_s22, %s3245_s21 }
  0x20   : > { %s3998_s0 = smov (%p46_p3, %s3996_s0), 0  ;;  %p185_p7 = scmp.eq.s32.totalorder %s3925_s29, 0 }
  0x21   : > { %3954 = sst [smem:[#allocation16_spill]] %s3998_s0  ;;  %p2889_p8 = scmp.lt.s32.totalorder %s3273_s28, 4 }
  0x22   : > { %s3426_s19 = scalar_select %p169_p4, %s3253_s23, %s171_s17  }
  0x23   : > { %s3432_s20 = sand.u32 1, %s3253_s23   ;;  %p3434_p9 = por %p185_p7, %p184_p6 }
  0x24   : > { %3955 = sst [smem:[#allocation17_spill]] %s3426_s19  ;;  %s562_s30 = sand.u32 1, %s3273_s28  }
  0x25   : > { %s3956_s27 = scalar_select %p3434_p9, 1, 0 }
  0x26   : > { %p3439_p10 = pnand %p2889_p8, %p180_p5  ;;  %s3928_s21 = sshll.u32 %s3432_s20, 8 }
  0x27   : > { %s3929_s17 = sshll.u32 %s3265_s26, 12  ;;  %s3958_s10 = sld [smem:[#allocation25_spill]] }
  0x28   : > { %s566_s23 = scalar_lea.vmem [#allocation5], %s3928_s21  ;;  %s3456_s14 = scalar_lea.sflag [#allocation6], %s562_s30 }
  0x29   : > { %s573_s15 = sshll.u32 %s566_s23, 4  ;;  %p3462_p12 = pneg %p3439_p10  ;;  %s3454_s15 = int_to_ptr.vmem [resolvable:$true] %s573_s15 }
  0x2d   : > { %s3450_s19 = scalar_lea.hbm %s3958_s10, %s3929_s17  ;;  %s3118_s21 = scalar_lea.hbm %s3958_s10, 8192 }
  0x2e   : > { %s3113_s1 = scalar_lea.hbm %s3450_s19, 4096  ;;  %p3119_p1 = scmp.lt.u32.totalorder %s3450_s19, %s3958_s10 }
  0x2f   : > { %p3114_p11 = scmp.ne.s32.totalorder %s3450_s19, %s3113_s1  ;;  %p3120_p2 = scmp.lt.u32.totalorder %s3118_s21, %s3113_s1 }
  0x30   : > { %p3122_p4 = scmp.lt.u32.totalorder %s3113_s1, %s3450_s19 }
  0x31   : > { %p3116_p13 = pnand %p3462_p12, %p3114_p11  ;;  %p3121_p3 = por %p3120_p2, %p3119_p1 }
  0x33   : > { %p3117_p0 = pneg %p3116_p13  ;;  %p3123_p5 = por %p3122_p4, %p3121_p3 }
  0x35   : > { %p3124_p6 = pnand %p3123_p5, %p3117_p0 }
  0x37   : > { %3127 = shalt.err (!%p3124_p6)
}
  0x38   : > { %s3128_s30 = scalar_lea.vmem %s3454_s15, 4096  ;;  %s3275_s29 = smov [#allocation5]  }
  0x39   : > { %p3129_p7 = scmp.ne.s32.totalorder %s3454_s15, %s3128_s30  ;;  %s3133_s0 = sshll.u32 %s3275_s29, 4  ;;  %s3134_s0 = int_to_ptr.vmem [resolvable:$false] %s3133_s0 }
  0x3a   : > { %s3135_s17 = scalar_lea.vmem %s3134_s0, 8192  ;;  %p3136_p13 = scmp.lt.s32.totalorder %s3454_s15, %s3134_s0 }
  0x3b   : > { %p3131_p8 = pnand %p3129_p7, %p3462_p12  ;;  %p3137_p9 = scmp.lt.s32.totalorder %s3135_s17, %s3128_s30 }
  0x3d   : > { %p3132_p11 = pneg %p3131_p8  ;;  %p3138_p1 = por %p3137_p9, %p3136_p13 }
  0x3f   : > { %p3139_p2 = pnand %p3138_p1, %p3132_p11 }
  0x41   : > { %3142 = shalt.err (!%p3139_p2)
}
  0x42   : > { %s3276_s1 = smov 256   ;;  %s3277_s21 = smov 16  }
  0x43   : > { %2885 = dma.hbm_to_vmem [thread:$0]  (!%p3439_p10), %s3450_s19, 4096, %s3454_s15, %s3456_s14, %s3276_s1, %s3276_s1, %s3277_s21  }
  0x44   : > { %s3960_s23 = sshll.u32 %s3265_s26, 12  ;;  %s3961_s12 = sld [smem:[#allocation27_spill]] }
  0x45   : > { %s3962_s17 = sshll.u32 %s3432_s20, 8  ;;  %p2569_p9 = scmp.ge.s32.totalorder %s3273_s28, 1 }
  0x46   : > { %s594_s10 = scalar_lea.vmem [#allocation7], %s3962_s17  ;;  %p615_p0 = scmp.lt.s32.totalorder %s3273_s28, 5 }
  0x47   : > { %s601_s11 = sshll.u32 %s594_s10, 4  ;;  %s2870_s9 = smul.u32 192, %s3432_s20  ;;  %s3495_s11 = int_to_ptr.vmem [resolvable:$true] %s601_s11 }
  0x48   : > { %p3499_p3 = pnand %p2569_p9, %p615_p0  ;;  %s2871_s15 = smul.u32 3072, %s3265_s26 }
  0x49   : > { %s3964_s5 = sld [smem:[#allocation21_spill]]  ;;  %s519_s10 = scalar_lea.vmem [#allocation3], %s2870_s9 }
  0x4a   : > { %s3491_s0 = scalar_lea.hbm %s3961_s12, %s3960_s23  ;;  %s526_s23 = sshll.u32 %s519_s10, 4  ;;  %s3510_s23 = int_to_ptr.vmem [resolvable:$true] %s526_s23 }
  0x4b   : > { %s3963_s13 = scalar_select %p3499_p3, 1, 0 }
  0x4c   : > { %s516_s30 = scalar_lea.sflag [#allocation4], %s3432_s20 }
  0x4f   : > { %s3508_s21 = scalar_lea.hbm %s3964_s5, %s2871_s15  ;;  %s3148_s19 = scalar_lea.hbm %s3964_s5, 6144 }
  0x50   : > { %s3143_s29 = scalar_lea.hbm %s3508_s21, 3072  ;;  %p3149_p7 = scmp.lt.u32.totalorder %s3508_s21, %s3964_s5 }
  0x51   : > { %p3144_p4 = scmp.ne.s32.totalorder %s3508_s21, %s3143_s29  ;;  %p3150_p8 = scmp.lt.u32.totalorder %s3148_s19, %s3143_s29 }
  0x52   : > { %p3152_p13 = scmp.lt.u32.totalorder %s3143_s29, %s3508_s21 }
  0x53   : > { %p3146_p5 = pnand %p3144_p4, %p3462_p12  ;;  %p3151_p11 = por %p3150_p8, %p3149_p7 }
  0x55   : > { %p3147_p6 = pneg %p3146_p5  ;;  %p3153_p1 = por %p3152_p13, %p3151_p11 }
  0x57   : > { %p3154_p2 = pnand %p3153_p1, %p3147_p6 }
  0x59   : > { %3157 = shalt.err (!%p3154_p2)
}
  0x5a   : > { %s3158_s9 = scalar_lea.vmem %s3510_s23, 3072  ;;  %s3278_s26 = smov [#allocation3]  }
  0x5b   : > { %p3159_p9 = scmp.ne.s32.totalorder %s3510_s23, %s3158_s9  ;;  %s3163_s10 = sshll.u32 %s3278_s26, 4  ;;  %s3164_s10 = int_to_ptr.vmem [resolvable:$false] %s3163_s10 }
  0x5c   : > { %s3165_s17 = scalar_lea.vmem %s3164_s10, 6144  ;;  %p3166_p5 = scmp.lt.s32.totalorder %s3510_s23, %s3164_s10 }
  0x5d   : > { %p3161_p0 = pnand %p3159_p9, %p3462_p12  ;;  %p3167_p3 = scmp.lt.s32.totalorder %s3165_s17, %s3158_s9 }
  0x5f   : > { %p3162_p4 = pneg %p3161_p0  ;;  %p3168_p7 = por %p3167_p3, %p3166_p5 }
  0x61   : > { %p3169_p8 = pnand %p3168_p7, %p3162_p4 }
  0x63   : > { %3172 = shalt.err (!%p3169_p8)
}
  0x64   : > { %s3279_s29 = smov 192   ;;  %s3280_s19 = smov 12  }
  0x65   : > { %2882 = dma.hbm_to_vmem [thread:$0]  (!%p3439_p10), %s3508_s21, 3072, %s3510_s23, %s516_s30, %s3279_s29, %s3279_s29, %s3280_s19  }
  0x66   : > { %s3173_s15 = scalar_lea.hbm %s3491_s0, 4096  ;;  %s3178_s26 = scalar_lea.hbm %s3961_s12, 8192 }
  0x67   : > { %p3174_p6 = scmp.ne.s32.totalorder %s3491_s0, %s3173_s15  ;;  %p3179_p13 = scmp.lt.u32.totalorder %s3491_s0, %s3961_s12 }
  0x68   : > { %p3180_p1 = scmp.lt.u32.totalorder %s3178_s26, %s3173_s15  ;;  %p3182_p9 = scmp.lt.u32.totalorder %s3173_s15, %s3491_s0 }
  0x69   : > { %p3176_p3 = pnand %p3174_p6, %p3462_p12 }
  0x6a   : > { %p3181_p2 = por %p3180_p1, %p3179_p13 }
  0x6b   : > { %p3177_p11 = pneg %p3176_p3 }
  0x6c   : > { %p3183_p0 = por %p3182_p9, %p3181_p2 }
  0x6e   : > { %p3184_p4 = pnand %p3183_p0, %p3177_p11 }
  0x70   : > { %3187 = shalt.err (!%p3184_p4)
}
  0x71   : > { %s3188_s20 = scalar_lea.vmem %s3495_s11, 4096  ;;  %s3281_s21 = smov [#allocation7]  }
  0x72   : > { %p3189_p5 = scmp.ne.s32.totalorder %s3495_s11, %s3188_s20  ;;  %s3193_s23 = sshll.u32 %s3281_s21, 4  ;;  %s3194_s23 = int_to_ptr.vmem [resolvable:$false] %s3193_s23 }
  0x73   : > { %s3195_s30 = scalar_lea.vmem %s3194_s23, 8192  ;;  %p3196_p6 = scmp.lt.s32.totalorder %s3495_s11, %s3194_s23 }
  0x74   : > { %p3191_p7 = pnand %p3189_p5, %p3462_p12  ;;  %p3197_p3 = scmp.lt.s32.totalorder %s3195_s30, %s3188_s20 }
  0x76   : > { %p3192_p8 = pneg %p3191_p7  ;;  %p3198_p13 = por %p3197_p3, %p3196_p6 }
  0x78   : > { %p3199_p1 = pnand %p3198_p13, %p3192_p8 }
  0x7a   : > { %3202 = shalt.err (!%p3199_p1)
}
  0x7b   : > { %s3282_s29 = smov 64   ;;  %s3283_s19 = smov 4  }
  0x7c   : > { %2888 = dma.hbm_to_vmem [thread:$0]  (!%p3439_p10), %s3491_s0, 4096, %s3495_s11, %s3456_s14, %s3282_s29, %s3282_s29, %s3283_s19  }
  0x7d   : > { %p3965_p12 = scmp.ne.s32.totalorder %s3963_s13, 0 }
  0x7e   : > { %s3561_s16 = sand.u32 (!%p3965_p12), 1, %s3249_s22   ;;  %p3966_p11 = scmp.ne.s32.totalorder (!%p3965_p12), %s3956_s27, 0 }
  0x7f   : > { %619 = sbr.rel (%p3965_p12) target bundleno = 2358 (0x936), region = 84  ;;  %s622_s1 = scalar_lea.sflag (!%p3965_p12), [#allocation4], %s3561_s16 }
  0x80   : > { %s2872_s15 = smul.u32 (!%p3965_p12), 192, %s3561_s16 }
  0x82   : > { %s3565_s9 = scalar_lea.vmem (!%p3965_p12), [#allocation3], %s2872_s15 }
  0x86   : > { %3236 = dma.done.wait (%p3966_p11), %s622_s1, 3072  }
  0x87   : > { %3238 = vsyncadd (%p3966_p11), %s622_s1, 4294964224  ;;  %s3967_s11 = sadd.s32 4294967295, %s3273_s28   ;;  %s2570_s14 = sshll.u32 %s3561_s16, 8 }
  0x88   : > { %s630_s13 = sand.u32 1, %s3967_s11   ;;  %s3574_s0 = scalar_lea.vmem [#allocation5], %s2570_s14 }
  0x89   : > { %s631_s18 = scalar_lea.sflag [#allocation6], %s630_s13 }
  0x8a   : > { %3240 = dma.done.wait (%p3966_p11), %s631_s18, 8192  }
  0x8b   : > { %3242 = vsyncadd (%p3966_p11), %s631_s18, 4294959104  ;;  %p732_p10 = scmp.lt.s32.totalorder %s3261_s25, 1  ;;  %p736_p2 = scmp.lt.s32.totalorder %s3257_s24, 1 }
  0x8c   : > { %s3968_s2 = sld [smem:[#allocation20_spill]]  ;;  %s3969_s6 = sld [smem:[#allocation22_spill]] }
  0x8d   : > { %s4000_s25 = smov (!%p732_p10, %s3261_s25), 1  ;;  %s3971_s30 = sld [smem:[#allocation24_spill]] }
  0x8e   : > { %s3584_s26 = scalar_select %p736_p2, %s3257_s24, 1 }
  0x8f   : > { %s2572_s10 = sshll.u32 %s4000_s25, 3  ;;  %s3972_s22 = sld [smem:[#allocation28_spill]] }
  0x90   : > { %s2691_s15 = sshll.u32 %s3584_s26, 6  ;;  %s2575_s29 = sshll.u32 %s3584_s26, 2 }
  0x91   : > { %s3973_s11 = sld [smem:[#allocation26_spill]]  ;;  %s3974_s5 = sld [smem:[#allocation31_spill]] }
  0x92   : > { %s735_s20 = scalar_lea.vmem %s3968_s2, %s2572_s10  ;;  %s3601_s13 = scalar_lea.vmem %s3969_s6, %s2691_s15 }
  0x93   : > { %s752_s2 = scalar_lea.vmem %s3914_s8, %s3584_s26  ;;  %s755_s12 = scalar_lea.vmem %s3971_s30, %s3584_s26 }
  0x94   : > { %s3630_s27 = scalar_lea.vmem [#allocation7], %s2570_s14  ;;  %p2577_p9 = scmp.ne.s32.totalorder %s3257_s24, 0 }
  0x95   : > { %s762_s28 = scalar_lea.vmem %s3972_s22, %s3584_s26  ;;  %v772_v0 = vld [vmem:[%s735_s20] sm:$0xff] (!%p2577_p9) }
  0x96   : > { %771 = sbr.rel (%p2577_p9) target bundleno = 157 (0x9d), region = 100  ;;  %773 = vst [vmem:[#allocation2] sm:$0xff] (!%p2577_p9), %v772_v0 }
  0x97   : > { %s3623_s6 = scalar_lea.vmem %s3973_s11, %s2575_s29  ;;  %s3628_s7 = scalar_lea.vmem %s3974_s5, %s2572_s10 }
  0x9d PF: > { %v3633_v1 = vld [vmem:[#allocation2] sm:$0xff]  ;;  %v2963_v3 = vld [vmem:[%s3565_s9 + $0x4] ss:$12 sps:$4 sm:$0xff]   ;;  %v3284_v4 = vmov 0.0   ;;  %v2965_v5 = vld [vmem:[%s3565_s9] ss:$12 sps:$4 sm:$0xff]   ;;  %s3976_s20 = scalar_lea.vmem %s3910_s4, %s3584_s26  ;;  %v1056_v44 = vlaneseq }
  0x9e   : > { %777 = vadd.xlane.f32.xlu0 %v3633_v1  ;;  %v781_v2 = vmul.f32 %v3633_v1, %v3633_v1  ;;  %2770 = vmatprep.subr.bf16.mxu1 %v3284_v4  ;;  %v2966_v6 = vld [vmem:[%s3565_s9 + $0x8] ss:$12 sps:$4 sm:$0xff]   ;;  %v2969_v8 = vld [vmem:[%s3565_s9 + $0x18] ss:$12 sps:$4 sm:$0xff]   ;;  %v2970_v9 = vld [vmem:[%s3565_s9 + $0x20] ss:$12 sps:$4 sm:$0xff]  }
  0x9f   : > { %966 = vmatprep.subr.bf16.mxu0 %v2963_v3  ;;  %2771 = vmatpush3.bf16.msra.mxu1 %v2966_v6  ;;  %v2967_v7 = vld [vmem:[%s3565_s9 + $0x1c] ss:$12 sps:$4 sm:$0xff]   ;;  %v2971_v10 = vld [vmem:[%s3565_s9 + $0x34] ss:$12 sps:$4 sm:$0xff]   ;;  %v2974_v12 = vld [vmem:[%s3565_s9 + $0x38] ss:$12 sps:$4 sm:$0xff]  }
  0xa0   : > { %967 = vmatpush1.bf16.msra.mxu0 %v2965_v5  ;;  %2772 = vmatprep.subr.bf16.mxu1 %v3284_v4  ;;  %v2973_v11 = vld [vmem:[%s3565_s9 + $0x30] ss:$12 sps:$4 sm:$0xff]   ;;  %v2975_v13 = vld [vmem:[%s3565_s9 + $0x4c] ss:$12 sps:$4 sm:$0xff]   ;;  %v2977_v14 = vld [vmem:[%s3565_s9 + $0x48] ss:$12 sps:$4 sm:$0xff]  }
  0xa1   : > { %968 = vmatprep.subr.bf16.mxu0 %v2967_v7  ;;  %v2978_v15 = vld [vmem:[%s3565_s9 + $0x50] ss:$12 sps:$4 sm:$0xff]   ;;  %v2981_v17 = vld [vmem:[%s3565_s9 + $0x60] ss:$12 sps:$4 sm:$0xff]   ;;  %v2982_v18 = vld [vmem:[%s3565_s9 + $0x68] ss:$12 sps:$4 sm:$0xff]  }
  0xa2   : > { %782 = vadd.xlane.f32.xlu0 %v781_v2  ;;  %v2979_v16 = vld [vmem:[%s3565_s9 + $0x64] ss:$12 sps:$4 sm:$0xff]   ;;  %v2983_v19 = vld [vmem:[%s3565_s9 + $0x7c] ss:$12 sps:$4 sm:$0xff]   ;;  %v2986_v21 = vld [vmem:[%s3565_s9 + $0x80] ss:$12 sps:$4 sm:$0xff]  }
  0xa3   : > { %2773 = vmatpush3.bf16.msra.mxu1 %v2970_v9  ;;  %v2985_v20 = vld [vmem:[%s3565_s9 + $0x78] ss:$12 sps:$4 sm:$0xff]   ;;  %v2987_v22 = vld [vmem:[%s3565_s9 + $0x94] ss:$12 sps:$4 sm:$0xff]   ;;  %v2989_v23 = vld [vmem:[%s3565_s9 + $0x90] ss:$12 sps:$4 sm:$0xff]  }
  0xa4   : > { %969 = vmatpush1.bf16.msra.mxu0 %v2969_v8  ;;  %2774 = vmatprep.subr.bf16.mxu1 %v3284_v4  ;;  %v2990_v24 = vld [vmem:[%s3565_s9 + $0x98] ss:$12 sps:$4 sm:$0xff]   ;;  %v3285_v25 = vmov 0   ;;  %vm3286_vm0 = vmmov 0   ;;  %v2993_v27 = vld [vmem:[%s3565_s9 + $0xa8] ss:$12 sps:$4 sm:$0xff]  }
  0xa5   : > { %970 = vmatprep.subr.bf16.mxu0 %v2971_v10  ;;  %998 = vmatprep.mubr.bf16.mxu0 %v3285_v25  ;;  %v2991_v26 = vld [vmem:[%s3565_s9 + $0xac] ss:$12 sps:$4 sm:$0xff]   ;;  %v2994_v28 = vld [vmem:[%s3565_s9 + $0xb0] ss:$12 sps:$4 sm:$0xff]   ;;  %s3975_s9 = scalar_lea.vmem %s3909_s3, %s3584_s26  ;;  %s3977_s17 = sld [smem:[#allocation19_spill]]  ;;  %v3699_v49 = vshrl.u32 %v1056_v44, 7 }
  0xa6   : > { %2786 = vmatprep.mubr.msk.bf16.mxu1 %vm3286_vm0, %v3284_v4  ;;  %v2578_v38 = vld [vmem:[%s3975_s9] ss:$0 sm:$0xff]  ;;  %vm1181_vm1 = vcmask 1043456   ;;  %s3978_s25 = sld [smem:[#allocation18_spill]]  ;;  %vm1101_vm2 = vcmask 64512   ;;  %s3979_s22 = sld [smem:[#allocation23_spill]] }
  0xa7   : > { %2775 = vmatpush3.bf16.msra.mxu1 %v2974_v12  ;;  %v2579_v40 = vld [vmem:[%s3976_s20] ss:$0 sm:$0xff]  ;;  %v3702_v53 = vsub.s32 0, %v3699_v49  ;;  %p2684_p0 = scmp.ne.s32.totalorder %s3257_s24, 1 }
  0xa8   : > { %971 = vmatpush1.bf16.msra.mxu0 %v2973_v11  ;;  %2776 = vmatprep.subr.bf16.mxu1 %v3284_v4  ;;  %s3984_s21 = sld [smem:[#allocation30_spill]] (!%p2684_p0) }
  0xa9   : > { %972 = vmatprep.subr.bf16.mxu0 %v2975_v13 }
  0xab   : > { %2777 = vmatpush3.bf16.msra.mxu1 %v2978_v15  ;;  %v1051_v45 = vld [vmem:[%s3977_s17] sm:$0x1]  ;;  %v1271_v46 = vld [vmem:[%s3977_s17 + $0x2] sm:$0x1]  ;;  %v1381_v47 = vld [vmem:[%s3977_s17 + $0x3] sm:$0x1] }
  0xac   : > { %973 = vmatpush1.bf16.msra.mxu0 %v2977_v14  ;;  %2778 = vmatprep.subr.bf16.mxu1 %v3284_v4  ;;  %v1052_v48 = vpack.c.bf16 %v1051_v45, %v1051_v45  ;;  %v1272_v50 = vpack.c.bf16 %v1271_v46, %v1271_v46  ;;  %v1382_v51 = vpack.c.bf16 %v1381_v47, %v1381_v47  ;;  %v1115_v60 = vld [vmem:[%s3977_s17 + $0x1] sm:$0x1]  ;;  %s3980_s9 = scalar_lea.vmem %s3979_s22, %s3584_s26 }
  0xad   : > { %974 = vmatprep.subr.bf16.mxu0 %v2979_v16  ;;  %v1116_v8 = vpack.c.bf16 %v1115_v60, %v1115_v60 }
  0xae   : > { %v1054_v52 = vpack.i.b16 %v1052_v48, %v1052_v48  ;;  %v1274_v54 = vpack.i.b16 %v1272_v50, %v1272_v50  ;;  %v1384_v55 = vpack.i.b16 %v1382_v51, %v1382_v51 }
  0xaf   : > { %2779 = vmatpush3.bf16.msra.mxu1 %v2982_v18  ;;  %v1118_v15 = vpack.i.b16 %v1116_v8, %v1116_v8 }
  0xb0   : > { %975 = vmatpush1.bf16.msra.mxu0 %v2981_v17  ;;  %2780 = vmatprep.subr.bf16.mxu1 %v3284_v4  ;;  %v1059_v58 = vrot.slane %v1054_v52, %v3702_v53  ;;  %v1279_v59 = vrot.slane %v1274_v54, %v3702_v53  ;;  %v1389_v0 = vrot.slane %v1384_v55, %v3702_v53 }
  0xb1   : > { %976 = vmatprep.subr.bf16.mxu0 %v2983_v19  ;;  %v1123_v19 = vrot.slane %v1118_v15, %v3702_v53  ;;  %v2998_v15 = vld [vmem:[%s3601_s13 + $0x18] sm:$0xff]  }
  0xb3   : > { %2781 = vmatpush3.bf16.msra.mxu1 %v2986_v21 }
  0xb4   : > { %977 = vmatpush1.bf16.msra.mxu0 %v2985_v20  ;;  %2782 = vmatprep.subr.bf16.mxu1 %v3284_v4 }
  0xb5   : > { %978 = vmatprep.subr.bf16.mxu0 %v2987_v22 }
  0xb7   : > { %2783 = vmatpush3.bf16.msra.mxu1 %v2990_v24  ;;  %v1050_v24 = vld [vmem:[%s3978_s25] sm:$0xff] }
  0xb8   : > { %979 = vmatpush1.bf16.msra.mxu0 %v2989_v23  ;;  %2784 = vmatprep.subr.bf16.mxu1 %v3284_v4 }
  0xb9   : > { %980 = vmatprep.subr.bf16.mxu0 %v2991_v26 }
  0xbb   : > { %2785 = vmatpush3.bf16.msra.mxu1 %v2994_v28 }
  0xbc   : > { %981 = vmatpush1.bf16.msra.mxu0 %v2993_v27  ;;  %2814 = vmatprep.subr.bf16.mxu1 %v3284_v4 }
  0xbd   : > { %2790 = vmatprep.subr.bf16.mxu0 %v3284_v4 }
 0x12b   : > { %v778_v29 = vpop.xlane.xlu0 %777 }
 0x12c   : > { %v780_v30 = vmul.f32 0.0078125, %v778_v29 }
 0x12e   : > { %v785_v32 = vmul.f32 %v780_v30, %v780_v30  ;;  %v787_v36 = vsub.f32 %v3633_v1, %v780_v30 }
 0x12f   : > { %v783_v31 = vpop.xlane.xlu0 %782 }
 0x130   : > { %v784_v33 = vmul.f32 0.0078125, %v783_v31 }
 0x132   : > { %v786_v34 = vsub.f32 %v784_v33, %v785_v32 }
 0x134   : > { %v788_v35 = vadd.f32 1e-05, %v786_v34 }
 0x136   : > { %3083 = vrsqrt.f32 %v788_v35 }
 0x140   : > { %v3084_v37 = vpop.eup %3083 }
 0x141   : > { %v790_v39 = vmul.f32 %v3084_v37, %v787_v36 }
 0x143   : > { %v797_v41 = vmul.f32 %v2578_v38, %v790_v39 }
 0x145   : > { %v804_v42 = vadd.f32 %v2579_v40, %v797_v41 }
 0x147   : > { %v805_v43 = vpack.c.bf16 %v804_v42, %v804_v42 }
 0x149   : > { %999 = vmatmul.mubr.bf16.vlgmr.msra.gmra.mrb[0].mxu0 %v805_v43  ;;  %2787 = vmatmul.mubr.bf16.vlgmr.msra.gmra.mrb[0].mxu1 %v805_v43 }
 0x14a   : > { %2792 = vmatprep.mubr.msk.bf16.mxu0 %vm3286_vm0, %v3284_v4  ;;  %2816 = vmatprep.mubr.msk.bf16.mxu1 %vm3286_vm0, %v3284_v4 }
 0x21c   : > { %v1000_v56 = vpop.f32.mrb[0].mxu0  ;;  %v1041_v57 = vpop.f32.mrb[0].mxu1 }
 0x21d   : > { %v1049_v61 = vpack.c.bf16 %v1041_v57, %v1041_v57  ;;  %v1002_v62 = vpop.f32.mrb[1].mxu0  ;;  %v2788_v63 = vpop.f32.mrb[1].mxu1  ;;  %v1047_v11 = vpack.c.bf16 %v1000_v56, %v1000_v56 }
 0x21e   : > { %v1048_v2 = vpack.c.bf16 %v1002_v62, %v1002_v62  ;;  %v1004_v3 = vpop.f32.mrb[2].mxu0  ;;  %v1044_v5 = vpop.f32.mrb[2].mxu1 }
 0x21f   : > { %v1005_v6 = vpop.f32.mrb[3].mxu0  ;;  %v2789_v7 = vpop.f32.mrb[3].mxu1  ;;  %v1114_v9 = vmul.bf16 %v1059_v58, %v1049_v61  ;;  %v1333_v10 = vmul.bf16 %v1279_v59, %v1049_v61  ;;  %v1443_v12 = vmul.bf16 %v1389_v0, %v1049_v61  ;;  %v1060_v17 = vmul.bf16 %v1059_v58, %v1047_v11 }
 0x220   : > { %2791 = vmatpush3.bf16.xpose.msra.mxu0 %v1048_v2  ;;  %2815 = vmatpush3.bf16.xpose.msra.mxu1 %v1048_v2  ;;  %v1280_v18 = vmul.bf16 %v1279_v59, %v1047_v11  ;;  %v1177_v20 = vmul.bf16 %v1123_v19, %v1049_v61  ;;  %v1124_v21 = vmul.bf16 %v1123_v19, %v1047_v11  ;;  %v3001_v19 = vld [vmem:[%s3601_s13 + $0x30] sm:$0xff]  }
 0x221   : > { %2796 = vmatprep.subr.bf16.mxu0 %v3284_v4  ;;  %2826 = vmatprep.subr.bf16.mxu1 %v3284_v4  ;;  %v3713_v13 = vsel %vm1181_vm1, %v1114_v9, 0  ;;  %v3716_v14 = vsel %vm1181_vm1, %v1333_v10, 0  ;;  %v3719_v16 = vsel %vm1181_vm1, %v1443_v12, 0  ;;  %v1390_v22 = vmul.bf16 %v1389_v0, %v1047_v11  ;;  %v2995_v10 = vld [vmem:[%s3601_s13] sm:$0xff]   ;;  %v2996_v11 = vld [vmem:[%s3601_s13 + $0x8] sm:$0xff]   ;;  %v2997_v12 = vld [vmem:[%s3601_s13 + $0x10] sm:$0xff]  }
 0x222   : > { %v1183_v23 = vsel %vm1181_vm1, %v1177_v20, 0 }
 0x227   : > { %2793 = vmatmul.mubr.bf16.vlgmr.msra.gmra.mrb[4].mxu0 %v1060_v17  ;;  %2817 = vmatmul.mubr.bf16.vlgmr.msra.gmra.mrb[4].mxu1 %v1280_v18  ;;  %v2999_v17 = vld [vmem:[%s3601_s13 + $0x20] sm:$0xff]   ;;  %v3000_v18 = vld [vmem:[%s3601_s13 + $0x28] sm:$0xff]  }
 0x228   : > { %2797 = vmatpush3.bf16.xpose.msra.mxu0 %v1048_v2  ;;  %2827 = vmatpush3.bf16.xpose.msra.mxu1 %v1048_v2 }
 0x229   : > { %2798 = vmatprep.mubr.msk.bf16.mxu0 %vm3286_vm0, %v3284_v4  ;;  %2828 = vmatprep.mubr.msk.bf16.mxu1 %vm3286_vm0, %v3284_v4 }
 0x22a   : > { %2802 = vmatprep.subr.bf16.mxu0 %v3284_v4  ;;  %2838 = vmatprep.subr.bf16.mxu1 %v3284_v4 }
 0x22f   : > { %2799 = vmatmul.mubr.bf16.vlgmr.msra.gmra.mrb[8].mxu0 %v1124_v21  ;;  %2829 = vmatmul.mubr.bf16.vlgmr.msra.gmra.mrb[8].mxu1 %v1390_v22 }
 0x230   : > { %2803 = vmatpush3.bf16.msra.mxu0 %v1183_v23  ;;  %2804 = vmatprep.mubr.msk.bf16.mxu0 %vm3286_vm0, %v3284_v4 }
 0x231   : > { %2808 = vmatprep.subr.bf16.mxu0 %v3284_v4  ;;  %2854 = vmatprep.mubr.msk.bf16.mxu1 %vm3286_vm0, %v3284_v4 }
 0x232   : > { %2839 = vmatpush3.bf16.msra.mxu1 %v2995_v10  ;;  %v3044_v10 = vld [vmem:[%s3574_s0 + $0xcc] ss:$16 sps:$4 sm:$0xff]  }
 0x233   : > { %2840 = vmatprep.subr.bf16.mxu1 %v3284_v4 }
 0x236   : > { %2841 = vmatpush3.bf16.msra.mxu1 %v2996_v11  ;;  %v3039_v11 = vld [vmem:[%s3574_s0 + $0xc0] ss:$16 sps:$4 sm:$0xff]  }
 0x237   : > { %2842 = vmatprep.subr.bf16.mxu1 %v3284_v4 }
 0x23a   : > { %2843 = vmatpush3.bf16.msra.mxu1 %v2997_v12  ;;  %v3042_v12 = vld [vmem:[%s3574_s0 + $0xc8] ss:$16 sps:$4 sm:$0xff]  }
 0x23b   : > { %2844 = vmatprep.subr.bf16.mxu1 %v3284_v4 }
 0x23e   : > { %2845 = vmatpush3.bf16.msra.mxu1 %v2998_v15  ;;  %v3047_v15 = vld [vmem:[%s3574_s0 + $0xe4] ss:$16 sps:$4 sm:$0xff]  }
 0x23f   : > { %2846 = vmatprep.subr.bf16.mxu1 %v3284_v4 }
 0x242   : > { %2847 = vmatpush3.bf16.msra.mxu1 %v2999_v17  ;;  %v3050_v17 = vld [vmem:[%s3574_s0 + $0xec] ss:$16 sps:$4 sm:$0xff]  }
 0x243   : > { %2848 = vmatprep.subr.bf16.mxu1 %v3284_v4 }
 0x246   : > { %2849 = vmatpush3.bf16.msra.mxu1 %v3000_v18  ;;  %v3045_v18 = vld [vmem:[%s3574_s0 + $0xe0] ss:$16 sps:$4 sm:$0xff]  }
 0x247   : > { %2850 = vmatprep.subr.bf16.mxu1 %v3284_v4 }
 0x24a   : > { %2851 = vmatpush3.bf16.msra.mxu1 %v3001_v19  ;;  %v3048_v19 = vld [vmem:[%s3574_s0 + $0xe8] ss:$16 sps:$4 sm:$0xff]  }
 0x24b   : > { %2852 = vmatprep.subr.bf16.mxu1 %v3284_v4 }
 0x2fa   : > { %v1095_v26 = vpop.f32.mrb[4].mxu0  ;;  %v1315_v27 = vpop.f32.mrb[4].mxu1 }
 0x2fb   : > { %v1316_v28 = vadd.f32 %v1315_v27, %v1050_v24  ;;  %v2794_v29 = vpop.f32.mrb[5].mxu0  ;;  %v2818_v30 = vpop.f32.mrb[5].mxu1  ;;  %v1096_v43 = vadd.f32 %v1095_v26, %v1050_v24 }
 0x2fc   : > { %v1098_v31 = vpop.f32.mrb[6].mxu0  ;;  %v1318_v32 = vpop.f32.mrb[6].mxu1 }
 0x2fd   : > { %v2795_v33 = vpop.f32.mrb[7].mxu0  ;;  %v2819_v34 = vpop.f32.mrb[7].mxu1  ;;  %v1321_v35 = vsel %vm1101_vm2, %v1316_v28, -inf  ;;  %v1102_v48 = vsel %vm1101_vm2, %v1096_v43, -inf }
 0x2fe   : > { %1322 = vmax.xlane.f32.xlu0 %v1321_v35  ;;  %v3002_v35 = vld [vmem:[%s3601_s13 + $0x38] sm:$0xff]  }
 0x2ff   : > { %2853 = vmatpush3.bf16.msra.mxu1 %v3002_v35  ;;  %v3052_v35 = vld [vmem:[%s3630_s27 + $0xc0] sm:$0xff]  }
 0x302   : > { %v1159_v36 = vpop.f32.mrb[8].mxu0  ;;  %v1425_v37 = vpop.f32.mrb[8].mxu1 }
 0x303   : > { %v1160_v38 = vadd.f32 %v1159_v36, %v1050_v24  ;;  %v2800_v39 = vpop.f32.mrb[9].mxu0  ;;  %v2830_v40 = vpop.f32.mrb[9].mxu1  ;;  %v1426_v47 = vadd.f32 %v1425_v37, %v1050_v24 }
 0x304   : > { %v1162_v41 = vpop.f32.mrb[10].mxu0  ;;  %v1428_v42 = vpop.f32.mrb[10].mxu1  ;;  %v3003_v39 = vld [vmem:[%s3574_s0] ss:$16 sps:$4 sm:$0xff]   ;;  %v3005_v40 = vld [vmem:[%s3574_s0 + $0x4] ss:$16 sps:$4 sm:$0xff]  }
 0x305   : > { %v2801_v44 = vpop.f32.mrb[11].mxu0  ;;  %v2831_v45 = vpop.f32.mrb[11].mxu1  ;;  %v1165_v46 = vsel %vm1101_vm2, %v1160_v38, -inf  ;;  %v1431_v50 = vsel %vm1101_vm2, %v1426_v47, -inf  ;;  %v3006_v41 = vld [vmem:[%s3574_s0 + $0x8] ss:$16 sps:$4 sm:$0xff]  }
 0x306   : > { %1166 = vmax.xlane.f32.xlu1 %v1165_v46  ;;  %v3008_v42 = vld [vmem:[%s3574_s0 + $0xc] ss:$16 sps:$4 sm:$0xff]   ;;  %v3009_v45 = vld [vmem:[%s3574_s0 + $0x20] ss:$16 sps:$4 sm:$0xff]   ;;  %v3012_v46 = vld [vmem:[%s3574_s0 + $0x28] ss:$16 sps:$4 sm:$0xff]  }
 0x307   : > { %v3014_v44 = vld [vmem:[%s3574_s0 + $0x2c] ss:$16 sps:$4 sm:$0xff]   ;;  %1889 = vmatprep.subr.bf16.mxu1 %v3008_v42  ;;  %v3061_v42 = vld [vmem:[%s3630_s27 + $0x10] sm:$0xff]  }
 0x30a   : > { %1103 = vmax.xlane.f32.xlu1 %v1102_v48 }
 0x30e   : > { %1432 = vmax.xlane.f32.xlu1 %v1431_v50 }
 0x38b   : > { %v1323_v51 = vpop.xlane.xlu0 %1322 }
 0x38c   : > { %v1324_v52 = vsub.f32 %v1316_v28, %v1323_v51 }
 0x38e   : > { %v1325_v56 = vmul.f32 1.442695, %v1324_v52 }
 0x393   : > { %v1167_v54 = vpop.xlane.xlu1 %1166 }
 0x394   : > { %v1168_v55 = vsub.f32 %v1160_v38, %v1167_v54 }
 0x396   : > { %v1169_v57 = vmul.f32 1.442695, %v1168_v55 }
 0x397   : > { %v1104_v58 = vpop.xlane.xlu1 %1103 }
 0x398   : > { %3085 = vpow2.f32 %v1169_v57  ;;  %v1105_v59 = vsub.f32 %v1096_v43, %v1104_v58  ;;  %v3011_v43 = vld [vmem:[%s3574_s0 + $0x24] ss:$16 sps:$4 sm:$0xff]   ;;  %v3020_v57 = vld [vmem:[%s3574_s0 + $0x4c] ss:$16 sps:$4 sm:$0xff]   ;;  %v3015_v58 = vld [vmem:[%s3574_s0 + $0x40] ss:$16 sps:$4 sm:$0xff]  }
 0x399   : > { %3087 = vpow2.f32 %v1325_v56  ;;  %v3017_v56 = vld [vmem:[%s3574_s0 + $0x44] ss:$16 sps:$4 sm:$0xff]  }
 0x39a   : > { %v1106_v60 = vmul.f32 1.442695, %v1105_v59  ;;  %v3018_v59 = vld [vmem:[%s3574_s0 + $0x48] ss:$16 sps:$4 sm:$0xff]  }
 0x39b   : > { %v1433_v61 = vpop.xlane.xlu1 %1432 }
 0x39c   : > { %3089 = vpow2.f32 %v1106_v60  ;;  %v1434_v62 = vsub.f32 %v1426_v47, %v1433_v61  ;;  %v3026_v60 = vld [vmem:[%s3574_s0 + $0x6c] ss:$16 sps:$4 sm:$0xff]   ;;  %v3021_v61 = vld [vmem:[%s3574_s0 + $0x60] ss:$16 sps:$4 sm:$0xff]  }
 0x39e   : > { %v1435_v63 = vmul.f32 1.442695, %v1434_v62  ;;  %v3024_v62 = vld [vmem:[%s3574_s0 + $0x68] ss:$16 sps:$4 sm:$0xff]  }
 0x3a0   : > { %3091 = vpow2.f32 %v1435_v63  ;;  %v3029_v63 = vld [vmem:[%s3574_s0 + $0x84] ss:$16 sps:$4 sm:$0xff]  }
 0x3a2   : > { %v3086_v0 = vpop.eup %3085 }
 0x3a3   : > { %v1171_v2 = vsel %vm1101_vm2, %v3086_v0, 0.0  ;;  %v3088_v3 = vpop.eup %3087 }
 0x3a4   : > { %1172 = vadd.xlane.f32.xlu0 %v1171_v2  ;;  %v1327_v6 = vsel %vm1101_vm2, %v3088_v3, 0.0  ;;  %v3027_v2 = vld [vmem:[%s3574_s0 + $0x80] ss:$16 sps:$4 sm:$0xff]  }
 0x3a6   : > { %v3090_v5 = vpop.eup %3089 }
 0x3a7   : > { %v1108_v7 = vsel %vm1101_vm2, %v3090_v5, 0.0 }
 0x3a8   : > { %1328 = vadd.xlane.f32.xlu0 %v1327_v6  ;;  %1109 = vadd.xlane.f32.xlu1 %v1108_v7  ;;  %v3038_v6 = vld [vmem:[%s3574_s0 + $0xac] ss:$16 sps:$4 sm:$0xff]   ;;  %v3033_v7 = vld [vmem:[%s3574_s0 + $0xa0] ss:$16 sps:$4 sm:$0xff]  }
 0x3aa   : > { %v3092_v8 = vpop.eup %3091 }
 0x3ab   : > { %v1437_v9 = vsel %vm1101_vm2, %v3092_v8, 0.0 }
 0x3ac   : > { %1438 = vadd.xlane.f32.xlu1 %v1437_v9  ;;  %v3041_v9 = vld [vmem:[%s3574_s0 + $0xc4] ss:$16 sps:$4 sm:$0xff]  }
 0x431   : > { %v1173_v20 = vpop.xlane.xlu0 %1172 }
 0x432   : > { %3093 = vrcp.f32 %v1173_v20 }
 0x435   : > { %v1110_v21 = vpop.xlane.xlu1 %1109  ;;  %v1329_v26 = vpop.xlane.xlu0 %1328 }
 0x436   : > { %3095 = vrcp.f32 %v1110_v21 }
 0x437   : > { %3097 = vrcp.f32 %v1329_v26 }
 0x439   : > { %v1439_v30 = vpop.xlane.xlu1 %1438 }
 0x43a   : > { %3099 = vrcp.f32 %v1439_v30  ;;  %v2617_v30 = vld [vmem:[%s752_s2] ss:$0 sm:$0xff] }
 0x43c   : > { %v3094_v22 = vpop.eup %3093 }
 0x43d   : > { %v1175_v23 = vmul.f32 %v3094_v22, %v3086_v0  ;;  %v3032_v0 = vld [vmem:[%s3574_s0 + $0x8c] ss:$16 sps:$4 sm:$0xff]  }
 0x43f   : > { %v1176_v24 = vpack.c.bf16 %v1175_v23, %v1175_v23 }
 0x440   : > { %v3096_v27 = vpop.eup %3095 }
 0x441   : > { %2805 = vmatmul.mubr.msk.bf16.vlgmr.msra.gmra.mrb[12].mxu0 %vm1101_vm2, %v1176_v24  ;;  %v1112_v28 = vmul.f32 %v3096_v27, %v3090_v5  ;;  %v3035_v5 = vld [vmem:[%s3574_s0 + $0xa4] ss:$16 sps:$4 sm:$0xff]  }
 0x442   : > { %2809 = vmatpush3.bf16.msra.mxu0 %v3713_v13  ;;  %2810 = vmatprep.mubr.msk.bf16.mxu0 %vm3286_vm0, %v3284_v4  ;;  %v3098_v13 = vpop.eup %3097 }
 0x443   : > { %2820 = vmatprep.subr.bf16.mxu0 %v3284_v4  ;;  %v1113_v29 = vpack.c.bf16 %v1112_v28, %v1112_v28  ;;  %v1331_v31 = vmul.f32 %v3098_v13, %v3088_v3  ;;  %v3030_v3 = vld [vmem:[%s3574_s0 + $0x88] ss:$16 sps:$4 sm:$0xff]  }
 0x445   : > { %v1332_v32 = vpack.c.bf16 %v1331_v31, %v1331_v31  ;;  %v2618_v31 = vld [vmem:[%s755_s12] ss:$0 sm:$0xff] }
 0x44d   : > { %2811 = vmatmul.mubr.msk.bf16.vlgmr.msra.gmra.mrb[12].mxu0 %vm1101_vm2, %v1113_v29 }
 0x44e   : > { %2821 = vmatpush3.bf16.msra.mxu0 %v3716_v14  ;;  %2822 = vmatprep.mubr.msk.bf16.mxu0 %vm3286_vm0, %v3284_v4  ;;  %v3100_v14 = vpop.eup %3099 }
 0x44f   : > { %2832 = vmatprep.subr.bf16.mxu0 %v3284_v4  ;;  %v1441_v33 = vmul.f32 %v3100_v14, %v3092_v8  ;;  %v3036_v8 = vld [vmem:[%s3574_s0 + $0xa8] ss:$16 sps:$4 sm:$0xff]  }
 0x451   : > { %v1442_v34 = vpack.c.bf16 %v1441_v33, %v1441_v33 }
 0x459   : > { %2823 = vmatmul.mubr.msk.bf16.vlgmr.msra.gmra.mrb[12].mxu0 %vm1101_vm2, %v1332_v32 }
 0x45a   : > { %2833 = vmatpush3.bf16.msra.mxu0 %v3719_v16  ;;  %2834 = vmatprep.mubr.msk.bf16.mxu0 %vm3286_vm0, %v3284_v4 }
 0x45b   : > { %1848 = vmatprep.subr.bf16.mxu0 %v3005_v40  ;;  %v3059_v40 = vld [vmem:[%s3630_s27 + $0x50] sm:$0xff]  }
 0x465   : > { %2835 = vmatmul.mubr.msk.bf16.vlgmr.msra.gmra.mrb[12].mxu0 %vm1101_vm2, %v1442_v34  ;;  %v3051_v34 = vld [vmem:[%s3630_s27 + $0x40] sm:$0xff]  }
 0x466   : > { %1880 = vmatprep.mubr.bf16.mxu0 %v3285_v25  ;;  %1849 = vmatpush1.bf16.msra.mxu0 %v3003_v39  ;;  %v3058_v39 = vld [vmem:[%s3630_s27 + $0x88] sm:$0xff]  }
 0x467   : > { %1850 = vmatprep.subr.bf16.mxu0 %v3011_v43  ;;  %v3062_v43 = vld [vmem:[%s3630_s27 + $0x90] sm:$0xff]  }
 0x46a   : > { %1851 = vmatpush1.bf16.msra.mxu0 %v3009_v45  ;;  %v3064_v45 = vld [vmem:[%s3630_s27 + $0xd8] sm:$0xff]  }
 0x46b   : > { %1852 = vmatprep.subr.bf16.mxu0 %v3017_v56  ;;  %v3073_v56 = vld [vmem:[%s3630_s27 + $0x28] sm:$0xff]  }
 0x46e   : > { %1853 = vmatpush1.bf16.msra.mxu0 %v3015_v58  ;;  %v3075_v58 = vld [vmem:[%s3630_s27 + $0x70] sm:$0xff]  }
 0x538   : > { %v1484_v36 = vpop.f32.mrb[12].mxu0 }
 0x539   : > { %v1491_v16 = vpack.c.bf16 %v1484_v36, %v1484_v36  ;;  %v2836_v37 = vpop.f32.mrb[13].mxu0  ;;  %v3053_v36 = vld [vmem:[%s3630_s27] sm:$0xff]  }
 0x53a   : > { %v1487_v38 = vpop.f32.mrb[14].mxu0  ;;  %v3055_v37 = vld [vmem:[%s3630_s27 + $0x48] sm:$0xff]  }
 0x53b   : > { %v2837_v4 = vpop.f32.mrb[15].mxu0  ;;  %2855 = vmatmul.mubr.bf16.vlgmr.msra.gmra.mrb[12].mxu1 %v1491_v16  ;;  %v3054_v16 = vld [vmem:[%s3630_s27 + $0x80] sm:$0xff]   ;;  %v3056_v38 = vld [vmem:[%s3630_s27 + $0xc8] sm:$0xff]  }
 0x53c   : > { %1921 = vmatprep.mubr.bf16.mxu1 %v3285_v25  ;;  %1890 = vmatpush1.bf16.msra.mxu1 %v3006_v41  ;;  %v2608_v25 = vld [vmem:[%s3980_s9] ss:$0 sm:$0xff]  ;;  %v3057_v4 = vld [vmem:[%s3630_s27 + $0x8] sm:$0xff]   ;;  %v3060_v41 = vld [vmem:[%s3630_s27 + $0xd0] sm:$0xff]  }
 0x53d   : > { %1891 = vmatprep.subr.bf16.mxu1 %v3014_v44  ;;  %v3063_v44 = vld [vmem:[%s3630_s27 + $0x58] sm:$0xff]  }
 0x540   : > { %1892 = vmatpush1.bf16.msra.mxu1 %v3012_v46  ;;  %v3065_v46 = vld [vmem:[%s3630_s27 + $0x18] sm:$0xff]  }
 0x541   : > { %1893 = vmatprep.subr.bf16.mxu1 %v3020_v57  ;;  %v3074_v57 = vld [vmem:[%s3630_s27 + $0xa8] sm:$0xff]  }
 0x544   : > { %1894 = vmatpush1.bf16.msra.mxu1 %v3018_v59  ;;  %v3076_v59 = vld [vmem:[%s3630_s27 + $0xf0] sm:$0xff]  }
 0x545   : > { %1895 = vmatprep.subr.bf16.mxu1 %v3026_v60  ;;  %v3078_v60 = vld [vmem:[%s3630_s27 + $0xb0] sm:$0xff]  }
 0x548   : > { %1896 = vmatpush1.bf16.msra.mxu1 %v3024_v62  ;;  %v3080_v62 = vld [vmem:[%s3630_s27 + $0xf8] sm:$0xff]  }
 0x549   : > { %1897 = vmatprep.subr.bf16.mxu1 %v3032_v0  ;;  %v3082_v0 = vld [vmem:[%s3630_s27 + $0xb8] sm:$0xff]  }
 0x54c   : > { %1898 = vmatpush1.bf16.msra.mxu1 %v3030_v3  ;;  %v1666_v3 = vld [vmem:[%s3623_s6] sm:$0xf] }
 0x54d   : > { %1899 = vmatprep.subr.bf16.mxu1 %v3038_v6  ;;  %v1682_v6 = vsub.s32 3, %v3699_v49 }
 0x550   : > { %1900 = vmatpush1.bf16.msra.mxu1 %v3036_v8 }
 0x551   : > { %1901 = vmatprep.subr.bf16.mxu1 %v3044_v10  ;;  %v1683_v10 = vrot.slane %v1666_v3, %v1682_v6 }
 0x554   : > { %1902 = vmatpush1.bf16.msra.mxu1 %v3042_v12 }
 0x555   : > { %1903 = vmatprep.subr.bf16.mxu1 %v3050_v17 }
 0x558   : > { %1904 = vmatpush1.bf16.msra.mxu1 %v3048_v19 }
 0x559   : > { %2748 = vmatprep.subr.bf16.mxu1 %v3052_v35 }
 0x60e   : > { %v1597_v47 = vpop.f32.mrb[12].mxu1 }
 0x60f   : > { %v1598_v48 = vadd.f32 %v2608_v25, %v1597_v47  ;;  %v2856_v50 = vpop.f32.mrb[13].mxu1  ;;  %v3066_v25 = vld [vmem:[%s3630_s27 + $0x98] sm:$0xff]   ;;  %v3067_v47 = vld [vmem:[%s3630_s27 + $0x60] sm:$0xff]  }
 0x610   : > { %v1600_v51 = vpop.f32.mrb[14].mxu1  ;;  %v3069_v50 = vld [vmem:[%s3630_s27 + $0x20] sm:$0xff]  }
 0x611   : > { %v3791_v52 = vadd.f32 %v1598_v48, %v3633_v1  ;;  %v2857_v54 = vpop.f32.mrb[15].mxu1  ;;  %v3023_v1 = vld [vmem:[%s3574_s0 + $0x64] ss:$16 sps:$4 sm:$0xff]  }
 0x612   : > { %1854 = vmatprep.subr.bf16.mxu0 %v3023_v1  ;;  %v3068_v48 = vld [vmem:[%s3630_s27 + $0xe0] sm:$0xff]   ;;  %v3071_v54 = vld [vmem:[%s3630_s27 + $0x68] sm:$0xff]   ;;  %v3077_v1 = vld [vmem:[%s3630_s27 + $0x30] sm:$0xff]  }
 0x613   : > { %1606 = vadd.xlane.f32.xlu0 %v3791_v52  ;;  %v1609_v55 = vmul.f32 %v3791_v52, %v3791_v52  ;;  %1855 = vmatpush1.bf16.msra.mxu0 %v3021_v61  ;;  %v3070_v51 = vld [vmem:[%s3630_s27 + $0xa0] sm:$0xff]   ;;  %v3079_v61 = vld [vmem:[%s3630_s27 + $0x78] sm:$0xff]  }
 0x614   : > { %1856 = vmatprep.subr.bf16.mxu0 %v3029_v63  ;;  %v3081_v63 = vld [vmem:[%s3630_s27 + $0x38] sm:$0xff]  }
 0x615   : > { %1610 = vadd.xlane.f32.xlu1 %v1609_v55  ;;  %v3072_v55 = vld [vmem:[%s3630_s27 + $0xe8] sm:$0xff]   ;;  %s3983_s27 = sld [smem:[#allocation29_spill]] (!%p2684_p0) }
 0x617   : > { %1857 = vmatpush1.bf16.msra.mxu0 %v3027_v2  ;;  %v1678_v2 = vsub.s32 2, %v3699_v49 }
 0x618   : > { %1858 = vmatprep.subr.bf16.mxu0 %v3035_v5  ;;  %v1674_v5 = vsub.s32 1, %v3699_v49 }
 0x619   : > { %v1679_v8 = vrot.slane %v1666_v3, %v1678_v2 }
 0x61b   : > { %1859 = vmatpush1.bf16.msra.mxu0 %v3033_v7  ;;  %v1671_v7 = vrot.slane %v1666_v3, %v3702_v53 }
 0x61c   : > { %1860 = vmatprep.subr.bf16.mxu0 %v3041_v9  ;;  %v1675_v9 = vrot.slane %v1666_v3, %v1674_v5 }
 0x61f   : > { %1861 = vmatpush1.bf16.msra.mxu0 %v3039_v11 }
 0x620   : > { %1862 = vmatprep.subr.bf16.mxu0 %v3047_v15 }
 0x623   : > { %1863 = vmatpush1.bf16.msra.mxu0 %v3045_v18 }
 0x624   : > { %2726 = vmatprep.subr.bf16.mxu0 %v3051_v34 }
 0x6a0   : > { %v1607_v20 = vpop.xlane.xlu0 %1606 }
 0x6a1   : > { %v1608_v21 = vmul.f32 0.0078125, %v1607_v20 }
 0x6a2   : > { %v1611_v22 = vpop.xlane.xlu1 %1610 }
 0x6a3   : > { %v1613_v23 = vmul.f32 %v1608_v21, %v1608_v21  ;;  %v1612_v24 = vmul.f32 0.0078125, %v1611_v22  ;;  %v1615_v28 = vsub.f32 %v3791_v52, %v1608_v21 }
 0x6a5   : > { %v1614_v26 = vsub.f32 %v1612_v24, %v1613_v23 }
 0x6a7   : > { %v1616_v27 = vadd.f32 1e-05, %v1614_v26 }
 0x6a9   : > { %3101 = vrsqrt.f32 %v1616_v27 }
 0x6b3   : > { %v3102_v29 = vpop.eup %3101 }
 0x6b4   : > { %v1618_v13 = vmul.f32 %v3102_v29, %v1615_v28 }
 0x6b6   : > { %v1625_v32 = vmul.f32 %v2617_v30, %v1618_v13 }
 0x6b8   : > { %v1632_v14 = vadd.f32 %v2618_v31, %v1625_v32 }
 0x6ba   : > { %v1633_v33 = vpack.c.bf16 %v1632_v14, %v1632_v14 }
 0x6bc   : > { %1881 = vmatmul.mubr.bf16.vlgmr.msra.gmra.mrb[16].mxu0 %v1633_v33  ;;  %1922 = vmatmul.mubr.bf16.vlgmr.msra.gmra.mrb[16].mxu1 %v1633_v33 }
 0x6bd   : > { %2727 = vmatpush3.bf16.msra.mxu0 %v3053_v36  ;;  %2749 = vmatpush3.bf16.msra.mxu1 %v3054_v16 }
 0x6be   : > { %2728 = vmatprep.subr.bf16.mxu0 %v3055_v37  ;;  %2750 = vmatprep.subr.bf16.mxu1 %v3056_v38 }
 0x6c1   : > { %2729 = vmatpush3.bf16.msra.mxu0 %v3057_v4  ;;  %2751 = vmatpush3.bf16.msra.mxu1 %v3058_v39 }
 0x6c2   : > { %2730 = vmatprep.subr.bf16.mxu0 %v3059_v40  ;;  %2752 = vmatprep.subr.bf16.mxu1 %v3060_v41 }
 0x6c5   : > { %2731 = vmatpush3.bf16.msra.mxu0 %v3061_v42  ;;  %2753 = vmatpush3.bf16.msra.mxu1 %v3062_v43 }
 0x6c6   : > { %2732 = vmatprep.subr.bf16.mxu0 %v3063_v44  ;;  %2754 = vmatprep.subr.bf16.mxu1 %v3064_v45 }
 0x6c9   : > { %2733 = vmatpush3.bf16.msra.mxu0 %v3065_v46  ;;  %2755 = vmatpush3.bf16.msra.mxu1 %v3066_v25 }
 0x6ca   : > { %2734 = vmatprep.subr.bf16.mxu0 %v3067_v47  ;;  %2756 = vmatprep.subr.bf16.mxu1 %v3068_v48 }
 0x6cd   : > { %2735 = vmatpush3.bf16.msra.mxu0 %v3069_v50  ;;  %2757 = vmatpush3.bf16.msra.mxu1 %v3070_v51 }
 0x6ce   : > { %2736 = vmatprep.subr.bf16.mxu0 %v3071_v54  ;;  %2758 = vmatprep.subr.bf16.mxu1 %v3072_v55 }
 0x6d1   : > { %2737 = vmatpush3.bf16.msra.mxu0 %v3073_v56  ;;  %2759 = vmatpush3.bf16.msra.mxu1 %v3074_v57 }
 0x6d2   : > { %2738 = vmatprep.subr.bf16.mxu0 %v3075_v58  ;;  %2760 = vmatprep.subr.bf16.mxu1 %v3076_v59 }
 0x6d5   : > { %2739 = vmatpush3.bf16.msra.mxu0 %v3077_v1  ;;  %2761 = vmatpush3.bf16.msra.mxu1 %v3078_v60 }
 0x6d6   : > { %2740 = vmatprep.subr.bf16.mxu0 %v3079_v61  ;;  %2762 = vmatprep.subr.bf16.mxu1 %v3080_v62 }
 0x6d9   : > { %2741 = vmatpush3.bf16.msra.mxu0 %v3081_v63  ;;  %2763 = vmatpush3.bf16.msra.mxu1 %v3082_v0  ;;  %v2651_v0 = vld [vmem:[%s762_s28] ss:$0 sm:$0xff] }
 0x78f   : > { %v1882_v11 = vpop.f32.mrb[16].mxu0  ;;  %v1923_v12 = vpop.f32.mrb[16].mxu1 }
 0x790   : > { %v1883_v15 = vadd.f32 %v1882_v11, %v1671_v7  ;;  %v1924_v17 = vadd.f32 %v1923_v12, %v1679_v8  ;;  %v1884_v18 = vpop.f32.mrb[17].mxu0  ;;  %v1925_v19 = vpop.f32.mrb[17].mxu1 }
 0x791   : > { %v1885_v20 = vadd.f32 %v1884_v18, %v1675_v9  ;;  %v1926_v21 = vadd.f32 %v1925_v19, %v1683_v10  ;;  %v1886_v22 = vpop.f32.mrb[18].mxu0  ;;  %v1927_v23 = vpop.f32.mrb[18].mxu1 }
 0x792   : > { %v1934_v24 = vmul.f32 0.044715, %v1883_v15  ;;  %v1936_v26 = vmul.f32 0.044715, %v1924_v17  ;;  %v1887_v27 = vpop.f32.mrb[19].mxu0  ;;  %v1928_v28 = vpop.f32.mrb[19].mxu1 }
 0x793   : > { %v1935_v49 = vmul.f32 0.044715, %v1885_v20  ;;  %v1937_v29 = vmul.f32 0.044715, %v1926_v21  ;;  %v1930_v43 = vmul.f32 0.5, %v1883_v15  ;;  %v1931_v46 = vmul.f32 0.5, %v1885_v20 }
 0x794   : > { %v1938_v53 = vmul.f32 %v1934_v24, %v1883_v15  ;;  %v1940_v30 = vmul.f32 %v1936_v26, %v1924_v17  ;;  %v1933_v48 = vmul.f32 0.5, %v1926_v21  ;;  %v1932_v55 = vmul.f32 0.5, %v1924_v17 }
 0x795   : > { %v1939_v13 = vmul.f32 %v1935_v49, %v1885_v20  ;;  %v1941_v31 = vmul.f32 %v1937_v29, %v1926_v21  ;;  %v2686_v49 = vld [vmem:[%s3984_s21] ss:$0 sm:$0xff] (!%p2684_p0) }
 0x796   : > { %v1942_v32 = vmul.f32 %v1938_v53, %v1883_v15  ;;  %v1944_v14 = vmul.f32 %v1940_v30, %v1924_v17 }
 0x797   : > { %v1943_v33 = vmul.f32 %v1939_v13, %v1885_v20  ;;  %v1945_v34 = vmul.f32 %v1941_v31, %v1926_v21 }
 0x798   : > { %v1946_v35 = vadd.f32 %v1942_v32, %v1883_v15  ;;  %v1948_v36 = vadd.f32 %v1944_v14, %v1924_v17 }
 0x799   : > { %v1947_v16 = vadd.f32 %v1943_v33, %v1885_v20  ;;  %v1949_v37 = vadd.f32 %v1945_v34, %v1926_v21 }
 0x79a   : > { %v1950_v38 = vmul.f32 0.7978846, %v1946_v35  ;;  %v1952_v40 = vmul.f32 0.7978846, %v1948_v36 }
 0x79b   : > { %v1951_v4 = vmul.f32 0.7978846, %v1947_v16  ;;  %v1953_v39 = vmul.f32 0.7978846, %v1949_v37 }
 0x79c   : > { %3103 = vtanh.f32 %v1950_v38 }
 0x79d   : > { %3105 = vtanh.f32 %v1951_v4 }
 0x79e   : > { %3107 = vtanh.f32 %v1953_v39 }
 0x79f   : > { %3109 = vtanh.f32 %v1952_v40 }
 0x7a6   : > { %v3104_v41 = vpop.eup %3103 }
 0x7a7   : > { %v3106_v42 = vpop.eup %3105  ;;  %v1958_v44 = vadd.f32 1.0, %v3104_v41 }
 0x7a8   : > { %v3108_v45 = vpop.eup %3107  ;;  %v1959_v25 = vadd.f32 1.0, %v3106_v42 }
 0x7a9   : > { %v3110_v47 = vpop.eup %3109  ;;  %v1961_v50 = vadd.f32 1.0, %v3108_v45  ;;  %v1962_v51 = vmul.f32 %v1958_v44, %v1930_v43 }
 0x7aa   : > { %v1963_v54 = vmul.f32 %v1959_v25, %v1931_v46  ;;  %v1960_v56 = vadd.f32 1.0, %v3110_v47 }
 0x7ab   : > { %v1965_v57 = vmul.f32 %v1961_v50, %v1933_v48  ;;  %v1966_v60 = vpack.c.bf16 %v1962_v51, %v1962_v51 }
 0x7ac   : > { %v1967_v58 = vpack.c.bf16 %v1963_v54, %v1963_v54  ;;  %v1964_v59 = vmul.f32 %v1960_v56, %v1932_v55 }
 0x7ad   : > { %v1969_v1 = vpack.c.bf16 %v1965_v57, %v1965_v57 }
 0x7ae   : > { %2265 = vmatprep.mubr.bf16.mxu0 %v1967_v58  ;;  %v1968_v61 = vpack.c.bf16 %v1964_v59, %v1964_v59 }
 0x7af   : > { %2305 = vmatprep.mubr.bf16.mxu1 %v1969_v1  ;;  %2266 = vmatmul.mubr.bf16.vlgmr.msra.gmra.mrb[20].mxu0 %v1966_v60 }
 0x7b0   : > { %2306 = vmatmul.mubr.bf16.vlgmr.msra.gmra.mrb[20].mxu1 %v1968_v61 }
 0x882   : > { %v2742_v62 = vpop.f32.mrb[20].mxu0 }
 0x883   : > { %v2764_v63 = vpop.f32.mrb[20].mxu1  ;;  %v2743_v2 = vpop.f32.mrb[21].mxu0 }
 0x884   : > { %v2744_v3 = vadd.f32 %v2743_v2, %v2742_v62  ;;  %v2765_v5 = vpop.f32.mrb[21].mxu1  ;;  %v2745_v6 = vpop.f32.mrb[22].mxu0 }
 0x885   : > { %v2766_v7 = vadd.f32 %v2765_v5, %v2764_v63  ;;  %v2767_v8 = vpop.f32.mrb[22].mxu1  ;;  %v2746_v9 = vpop.f32.mrb[23].mxu0 }
 0x886   : > { %v2268_v10 = vadd.f32 %v2744_v3, %v2651_v0  ;;  %v2768_v11 = vpop.f32.mrb[23].mxu1  ;;  %2318 = sbr.rel (%p2684_p0) target bundleno = 2358 (0x936), region = 104 }
 0x888   : > { %v2308_v12 = vadd.f32 %v2766_v7, %v2268_v10 }
 0x88a   : > { %v2313_v15 = vadd.f32 %v2308_v12, %v3791_v52  ;;  %v2685_v52 = vld [vmem:[%s3983_s27] ss:$0 sm:$0xff] (!%p2684_p0) }
 0x88c   : > { %2314 = vst [vmem:[#allocation2] sm:$0xff] %v2313_v15  ;;  %2321 = vadd.xlane.f32.xlu0 (!%p2684_p0), %v2313_v15  ;;  %v2324_v17 = vmul.f32 (!%p2684_p0), %v2313_v15, %v2313_v15 }
 0x890   : > { %2325 = vadd.xlane.f32.xlu0 %v2324_v17 }
 0x919   : > { %v2322_v18 = vpop.xlane.xlu0 %2321 }
 0x91a   : > { %v2323_v19 = vmul.f32 0.0078125, %v2322_v18 }
 0x91c   : > { %v2328_v21 = vmul.f32 %v2323_v19, %v2323_v19  ;;  %v2330_v26 = vsub.f32 %v2313_v15, %v2323_v19 }
 0x91d   : > { %v2326_v20 = vpop.xlane.xlu0 %2325 }
 0x91e   : > { %v2327_v22 = vmul.f32 0.0078125, %v2326_v20 }
 0x920   : > { %v2329_v23 = vsub.f32 %v2327_v22, %v2328_v21 }
 0x922   : > { %v2331_v24 = vadd.f32 1e-05, %v2329_v23 }
 0x924   : > { %3111 = vrsqrt.f32 %v2331_v24 }
 0x92e   : > { %v3112_v27 = vpop.eup %3111 }
 0x92f   : > { %v2333_v28 = vmul.f32 %v3112_v27, %v2330_v26 }
 0x931   : > { %v2340_v29 = vmul.f32 %v2685_v52, %v2333_v28 }
 0x933   : > { %v2347_v53 = vadd.f32 %v2686_v49, %v2340_v29 }
 0x935   : > { %2348 = vst [vmem:[%s3628_s7] sm:$0xff] %v2347_v53 }
 0x936 PF: > { %s3985_s23 = sld [smem:[#allocation14_spill]]  ;;  %s3986_s21 = sld [smem:[#allocation10_spill]] }
 0x937   : > { %s3987_s22 = sld [smem:[#allocation11_spill]]  ;;  %s3989_s24 = sld [smem:[#allocation12_spill]] }
 0x938   : > { %s3990_s25 = sld [smem:[#allocation13_spill]]  ;;  %s3991_s26 = sld [smem:[#allocation15_spill]] }
 0x939   : > { %s3992_s27 = sld [smem:[#allocation16_spill]] }
 0x93c   : > { %s32_s28 = sadd.s32 1, %s3985_s23   ;;  %s3988_s23 = sld [smem:[#allocation17_spill]] }
 0x93d   : > { %p29_p4 = scmp.ge.s32.totalorder %s32_s28, 6  }
 0x93f   :  { %31 = sbr.rel (!%p29_p4) target bundleno = 22 (0x16), region = 183 }
 0x946   :  { %2368 = vsyncpa [#allocation4], 1 }
 0x947   :  { %2370 = vsyncpa [#allocation4 + $0x1], 1 }
 0x948   :  { %2371 = vsyncpa [#allocation6], 1 }
 0x949   :  { %2373 = vsyncpa [#allocation6 + $0x1], 1 }

</bundles_post_ra>
